<compile_context>
chip_gen: v5e
topology: v5e:2x2
jax: 0.10.0
libtpu: 0.0.40
codegen_flags: <defaults>
</compile_context>

<pallas_src>
import functools

import numpy as np
import jax
import jax.numpy as jnp
from jax import lax
from jax.experimental import pallas as pl
from jax.experimental.pallas import tpu as pltpu

SA_K = 7  # SALayer kernel size (fixed at 7 in the module)


# ----------------------------------------------------------------------------
# Host-side weight preprocessing (numpy, once per call, outside the kernel).
# ----------------------------------------------------------------------------
def _build_conv_mats(wgt, W):
    """(K, K, Cin, Cout) HWIO -> (K, W*Cin, W*Cout).

    Block dy is the banded matrix applied to input row h+dy-K//2; SAME zero
    padding along W is folded in (out-of-range taps simply absent).  The KxK
    conv becomes K accumulating MXU dots against row-shifted image views.
    """
    wgt = np.asarray(wgt, np.float32)
    K, _, Cin, Cout = wgt.shape
    p = K // 2
    out = np.zeros((K, W, Cin, W, Cout), np.float32)   # (dy, wi, ci, wo, co)
    wo = np.arange(W)
    for dy in range(K):
        for dx in range(K):
            wi = wo + dx - p
            m = (wi >= 0) & (wi < W)
            out[dy, wi[m], :, wo[m], :] = wgt[dy, dx]
    return out.reshape(K, W * Cin, W * Cout)


def _build_sa_mats(sa_w, W, C):
    """(7, 7, 2, 1) HWIO -> (7, 2*W, W*C), gate broadcast folded in.

    Block dy acts on the row-shifted [avg | max] pair (pair columns 0..W-1 =
    avg, W..2W-1 = max).  Each output column w is replicated across its C
    lanes, so sigmoid(sum_dy pair_dy @ mat_dy) IS the channel-broadcast gate
    (exact: sigmoid commutes with pure column duplication).
    """
    sa_w = np.asarray(sa_w, np.float32)
    K = sa_w.shape[0]
    p = K // 2
    mats = np.zeros((K, 2, W, W), np.float32)          # (dy, {avg,max}, wi, wo)
    wo = np.arange(W)
    for dy in range(K):
        for dx in range(K):
            wi = wo + dx - p
            m = (wi >= 0) & (wi < W)
            mats[dy, 0, wi[m], wo[m]] = sa_w[dy, dx, 0, 0]
            mats[dy, 1, wi[m], wo[m]] = sa_w[dy, dx, 1, 0]
    mats = mats.reshape(K, 2 * W, W)                   # rows: [avg(W); max(W)]
    return np.repeat(mats, C, axis=2)                  # (K, 2W, W*C)


def _build_pair_mat(W, C):
    """(2*W*C, 2*W) matrix computing [channel-mean | channel-max-select].

    LHS columns 0..WC-1 are `res`; columns WC..2WC-1 are the running-max
    tensor whose lane w*C holds max(channel group w) (see the shift tree in
    the kernel).  Output columns: 0..W-1 = mean, W..2W-1 = max.
    """
    WC = W * C
    pm = np.zeros((2 * WC, 2 * W), np.float32)
    pm[:WC, :W] = np.kron(np.eye(W), np.ones((C, 1), np.float32) / C)
    e0 = np.zeros((C, 1), np.float32)
    e0[0, 0] = 1.0
    pm[WC:, W:] = np.kron(np.eye(W), e0)
    return pm


# ----------------------------------------------------------------------------
# Fused SAB kernel: bb images per grid step, everything stays in VMEM/vregs.
# All arrays are 2-D (rows = bb*H image rows, cols = W*C lanes).
# ----------------------------------------------------------------------------
def _sab_kernel(x_ref, w1_ref, w2_ref, wsa_ref, pm_ref, out_ref, *, H, C):
    f32 = jnp.float32
    cdt = w1_ref.dtype                    # MXU operand dtype (bf16 by default)
    BH, WC = x_ref.shape                  # BH = images_per_step * H

    x = x_ref[...]                        # (BH, WC) f32, lane-dense rows

    # Row index within each image: H-direction shifts must not leak across
    # image boundaries when several images are stacked per grid step.
    rowpos = lax.broadcasted_iota(jnp.int32, (BH, 1), 0) % H

    def rowshift(img, d):
        # v[i] = img[i + d] if row i+d belongs to the same image, else 0.
        if d == 0:
            return img
        X = img.shape[-1]
        z = jnp.zeros((abs(d), X), img.dtype)
        if d > 0:
            v = jnp.concatenate([img[d:, :], z], axis=0)
            keep = rowpos < (H - d)
        else:
            v = jnp.concatenate([z, img[:BH + d, :]], axis=0)
            keep = rowpos >= (-d)
        return v * keep.astype(jnp.float32).astype(img.dtype)

    def conv3(img, w_ref):
        # 3x3 SAME conv = 3 accumulating MXU dots (one per row tap, K = WC);
        # W-direction taps + padding live inside each (WC, WC) weight block.
        acc = jnp.dot(rowshift(img, -1), w_ref[0], preferred_element_type=f32)
        acc = acc + jnp.dot(img, w_ref[1], preferred_element_type=f32)
        acc = acc + jnp.dot(rowshift(img, 1), w_ref[2], preferred_element_type=f32)
        return acc                        # (BH, WC) f32

    # ---- body: conv3x3 -> ReLU -> conv3x3 (operands cdt, f32 accumulate) ----
    r1 = jnp.maximum(conv3(x.astype(cdt), w1_ref), 0.0)
    res = conv3(r1.astype(cdt), w2_ref)   # (BH, WC) f32

    # ---- SALayer channel stats, fully vectorized ----------------------------
    # Running max of each C-lane channel group via a log2(C)-step shift-left /
    # max tree (explicit slice+concat => exact, direction-controlled borders);
    # afterwards lane w*C holds max(group w).  Channel mean + max-lane
    # selection are then ONE MXU dot against the precomputed pm matrix.
    t = res
    remaining, step = C - 1, 1
    while remaining > 0:
        sh = min(step, remaining)
        pad = jnp.full((BH, sh), -jnp.inf, f32)
        t = jnp.maximum(t, jnp.concatenate([t[:, sh:], pad], axis=-1))
        remaining -= sh
        step *= 2
    pair = jnp.dot(jnp.concatenate([res, t], axis=-1).astype(cdt), pm_ref[...],
                   preferred_element_type=f32)        # (BH, 2W): [mean | max]

    # ---- 7x7 SA conv (2->1), gate broadcast folded into the weights ---------
    # 7 accumulating dots over row-shifted views of the pair -> (BH, WC).
    pair_c = pair.astype(cdt)
    p = SA_K // 2
    s = jnp.dot(rowshift(pair_c, -p), wsa_ref[0], preferred_element_type=f32)
    for dy in range(1, SA_K):
        s = s + jnp.dot(rowshift(pair_c, dy - p), wsa_ref[dy],
                        preferred_element_type=f32)
    gate = jax.nn.sigmoid(s)              # (BH, WC) f32, lane-dense (EUP exp)

    # ---- spatial gate + residual, lane-dense store ---------------------------
    out_ref[...] = res * gate + x


# ----------------------------------------------------------------------------
# SAB forward (NHWC in / NHWC out)
# ----------------------------------------------------------------------------
def _pick_batch_block(N, H, target_rows=256):
    """Images per grid step: push matmul M (= bb*H) toward the MXU's 256-row
    sweet spot while keeping >= 2 grid steps when possible so both v7x
    TensorCores get work (grid axis is "parallel")."""
    best = 1
    for d in range(1, N + 1):
        if N % d:
            continue
        if d * H > max(target_rows, H):
            break
        if N // d >= 2 or N == 1:
            best = d
    return best


def sab_forward(x_nhwc, w1, w2, sa_w, *, compute_dtype=jnp.bfloat16,
                batch_block=None):
    """x_nhwc: (N,H,W,C); w1,w2: (3,3,C,C) HWIO; sa_w: (7,7,2,1) HWIO.

    compute_dtype is the MXU *operand* dtype (accumulation is always f32 and
    all elementwise work stays f32); bf16 hits MXU peak on v5e/v6e/v7x.
    """
    N, H, W, C = x_nhwc.shape
    WC = W * C
    if WC % 128 or H % 8:
        raise NotImplementedError("needs W*C % 128 == 0 and H % 8 == 0")

    bb = _pick_batch_block(N, H) if batch_block is None else batch_block
    assert N % bb == 0

    x2 = x_nhwc.astype(jnp.float32).reshape(N * H, WC)        # lane-dense rows

    w1m = jnp.asarray(_build_conv_mats(w1, W), compute_dtype)     # (3, WC, WC)
    w2m = jnp.asarray(_build_conv_mats(w2, W), compute_dtype)     # (3, WC, WC)
    wsam = jnp.asarray(_build_sa_mats(sa_w, W, C), compute_dtype)  # (7,2W,WC)
    pm = jnp.asarray(_build_pair_mat(W, C), compute_dtype)        # (2WC, 2W)

    out2 = pl.pallas_call(
        functools.partial(_sab_kernel, H=H, C=C),
        out_shape=jax.ShapeDtypeStruct((N * H, WC), jnp.float32),
        grid=(N // bb,),
        in_specs=[
            pl.BlockSpec((bb * H, WC), lambda n: (n, 0)),
            pl.BlockSpec((3, WC, WC), lambda n: (0, 0, 0)),
            pl.BlockSpec((3, WC, WC), lambda n: (0, 0, 0)),
            pl.BlockSpec((SA_K, 2 * W, WC), lambda n: (0, 0, 0)),
            pl.BlockSpec((2 * WC, 2 * W), lambda n: (0, 0)),
        ],
        out_specs=pl.BlockSpec((bb * H, WC), lambda n: (n, 0)),
        compiler_params=pltpu.CompilerParams(
            dimension_semantics=("parallel",)),   # megacore over batch blocks
    )(x2, w1m, w2m, wsam, pm)
    return out2.reshape(N, H, W, C)


# Pure-JAX reference (correctness check only)
def sab_ref(x, w1, w2, sa_w):
    dn = ('NHWC', 'HWIO', 'NHWC')
    res = lax.conv_general_dilated(x, w1, (1, 1), 'SAME', dimension_numbers=dn)
    res = jnp.maximum(res, 0.0)
    res = lax.conv_general_dilated(res, w2, (1, 1), 'SAME', dimension_numbers=dn)
    avg = jnp.mean(res, axis=-1, keepdims=True)
    mx = jnp.max(res, axis=-1, keepdims=True)
    y = jnp.concatenate([avg, mx], axis=-1)
    y = lax.conv_general_dilated(y, sa_w, (1, 1), 'SAME', dimension_numbers=dn)
    gate = jax.nn.sigmoid(y)
    return res * gate + x


if __name__ == "__main__":
    key = jax.random.PRNGKey(0)
    k1, k2, k3, k4 = jax.random.split(key, 4)

    # Small shapes consistent with the module: n_feat=8, kernel_size=3.
    # W*C = 128 -> every image row is one full lane tile; N=4 so the batched
    # grid path (2 images per step, 2 parallel steps) is exercised.
    N, C, H, W = 4, 8, 16, 16
    K = 3

    # PyTorch-convention NCHW input.
    x_nchw = jax.random.normal(k1, (N, C, H, W), jnp.float32)

    # Deterministic synthetic weights (HWIO for the NHWC kernels, bias=False).
    w1 = jax.random.normal(k2, (K, K, C, C), jnp.float32) * 0.1          # body conv1
    w2 = jax.random.normal(k3, (K, K, C, C), jnp.float32) * 0.1          # body conv2
    sa_w = jax.random.normal(k4, (SA_K, SA_K, 2, 1), jnp.float32) * 0.05  # SA conv

    x = jnp.transpose(x_nchw, (0, 2, 3, 1))      # NCHW -> NHWC (layout plumbing)
    ref = sab_ref(x, w1, w2, sa_w)

    # f32 MXU-operand path: tight correctness check.
    out_f32 = jax.block_until_ready(
        sab_forward(x, w1, w2, sa_w, compute_dtype=jnp.float32))
    err_f32 = float(jnp.max(jnp.abs(out_f32 - ref)))
    assert jnp.allclose(out_f32, ref, atol=1e-3, rtol=1e-3), err_f32

    # Default bf16 MXU-operand path (peak MXU on v5e/v6e/v7x): loose check.
    out = jax.block_until_ready(sab_forward(x, w1, w2, sa_w))
    err_bf16 = float(jnp.max(jnp.abs(out - ref)))
    assert jnp.allclose(out, ref, atol=5e-2, rtol=5e-2), err_bf16

    out_nchw = jnp.transpose(out, (0, 3, 1, 2))  # back to PyTorch NCHW
    print("KERNEL_OK")
</pallas_src>

<mosaic_0001>
module attributes {stable_mosaic.version = 11 : i64} {
  func.func @_sab_kernel(%arg0: i32, %arg1: memref<32x128xf32, #tpu.memory_space<vmem>>, %arg2: memref<3x128x128xf32, #tpu.memory_space<vmem>>, %arg3: memref<3x128x128xf32, #tpu.memory_space<vmem>>, %arg4: memref<7x32x128xf32, #tpu.memory_space<vmem>>, %arg5: memref<256x32xf32, #tpu.memory_space<vmem>>, %arg6: memref<32x128xf32, #tpu.memory_space<vmem>>) attributes {dimension_semantics = [#tpu.dimension_semantics<parallel>], iteration_bounds = array<i64: 2>, scalar_prefetch = 0 : i64, scratch_operands = 0 : i64, tpu.core_type = #tpu.core_type<tc>, window_params = [{transform_indices = @transform_0, window_bounds = array<i64: 32, 128>}, {pipeline_mode = #tpu.pipeline_mode<synchronous>, transform_indices = @transform_1, window_bounds = array<i64: 3, 128, 128>}, {pipeline_mode = #tpu.pipeline_mode<synchronous>, transform_indices = @transform_2, window_bounds = array<i64: 3, 128, 128>}, {pipeline_mode = #tpu.pipeline_mode<synchronous>, transform_indices = @transform_3, window_bounds = array<i64: 7, 32, 128>}, {pipeline_mode = #tpu.pipeline_mode<synchronous>, transform_indices = @transform_4, window_bounds = array<i64: 256, 32>}, {transform_indices = @transform_5, window_bounds = array<i64: 32, 128>}]} {
    %c0 = arith.constant 0 : index
    %c0_0 = arith.constant 0 : index
    %0 = vector.load %arg1[%c0, %c0_0] : memref<32x128xf32, #tpu.memory_space<vmem>>, vector<32x128xf32>
    %1 = tpu.iota {dimensions = array<i32: 0>} : vector<32x1xi32>
    %c16_i32 = arith.constant 16 : i32
    %c0_i32 = arith.constant 0 : i32
    %2 = arith.cmpi eq, %c16_i32, %c0_i32 : i32
    %c1_i32 = arith.constant 1 : i32
    %3 = arith.select %2, %c1_i32, %c16_i32 : i32
    %4 = vector.broadcast %3 : i32 to vector<32x1xi32>
    %5 = arith.remsi %1, %4 : vector<32x1xi32>
    %c0_i32_1 = arith.constant 0 : i32
    %6 = vector.broadcast %c0_i32_1 : i32 to vector<32x1xi32>
    %7 = arith.cmpi ne, %5, %6 : vector<32x1xi32>
    %c0_i32_2 = arith.constant 0 : i32
    %8 = vector.broadcast %c0_i32_2 : i32 to vector<32x1xi32>
    %9 = arith.cmpi slt, %5, %8 : vector<32x1xi32>
    %c0_i32_3 = arith.constant 0 : i32
    %10 = arith.cmpi slt, %3, %c0_i32_3 : i32
    %11 = vector.broadcast %10 : i1 to vector<32x1xi1>
    %12 = vector.broadcast %11 : vector<32x1xi1> to vector<32x1xi1>
    %13 = arith.xori %9, %12 : vector<32x1xi1>
    %14 = arith.andi %13, %7 : vector<32x1xi1>
    %15 = vector.broadcast %3 : i32 to vector<32x1xi32>
    %16 = arith.addi %5, %15 : vector<32x1xi32>
    %17 = arith.select %14, %16, %5 : vector<32x1xi1>, vector<32x1xi32>
    %cst = arith.constant 0.000000e+00 : f32
    %18 = vector.broadcast %cst : f32 to vector<1x128xf32>
    %19 = vector.extract_strided_slice %0 {offsets = [0, 0], sizes = [31, 128], strides = [1, 1]} : vector<32x128xf32> to vector<31x128xf32>
    %20 = tpu.concatenate %18, %19 in 0 : vector<1x128xf32>, vector<31x128xf32> -> vector<32x128xf32>
    %c1_i32_4 = arith.constant 1 : i32
    %21 = vector.broadcast %c1_i32_4 : i32 to vector<32x1xi32>
    %22 = arith.cmpi sge, %17, %21 : vector<32x1xi32>
    %23 = arith.extui %22 : vector<32x1xi1> to vector<32x1xi32>
    %24 = arith.sitofp %23 : vector<32x1xi32> to vector<32x1xf32>
    %25 = vector.broadcast %24 : vector<32x1xf32> to vector<32x128xf32>
    %26 = arith.mulf %20, %25 : vector<32x128xf32>
    %c0_5 = arith.constant 0 : index
    %c0_6 = arith.constant 0 : index
    %c0_7 = arith.constant 0 : index
    %27 = vector.load %arg2[%c0_5, %c0_6, %c0_7] : memref<3x128x128xf32, #tpu.memory_space<vmem>>, vector<1x128x128xf32>
    %28 = vector.shape_cast %27 : vector<1x128x128xf32> to vector<128x128xf32>
    %cst_8 = arith.constant dense<0.000000e+00> : vector<32x128xf32>
    %29 = tpu.matmul %26, %28, %cst_8 {dimension_numbers = #tpu.dot_dimension_numbers<[1], [0], [0], [1], [0, 0, 1, 1], [], []>} : vector<32x128xf32>, vector<128x128xf32>, vector<32x128xf32> -> vector<32x128xf32>
    %c1 = arith.constant 1 : index
    %c0_9 = arith.constant 0 : index
    %c0_10 = arith.constant 0 : index
    %30 = vector.load %arg2[%c1, %c0_9, %c0_10] : memref<3x128x128xf32, #tpu.memory_space<vmem>>, vector<1x128x128xf32>
    %31 = vector.shape_cast %30 : vector<1x128x128xf32> to vector<128x128xf32>
    %cst_11 = arith.constant dense<0.000000e+00> : vector<32x128xf32>
    %32 = tpu.matmul %0, %31, %cst_11 {dimension_numbers = #tpu.dot_dimension_numbers<[1], [0], [0], [1], [0, 0, 1, 1], [], []>} : vector<32x128xf32>, vector<128x128xf32>, vector<32x128xf32> -> vector<32x128xf32>
    %33 = arith.addf %29, %32 : vector<32x128xf32>
    %cst_12 = arith.constant 0.000000e+00 : f32
    %34 = vector.broadcast %cst_12 : f32 to vector<1x128xf32>
    %35 = vector.extract_strided_slice %0 {offsets = [1, 0], sizes = [31, 128], strides = [1, 1]} : vector<32x128xf32> to vector<31x128xf32>
    %36 = tpu.concatenate %35, %34 in 0 : vector<31x128xf32>, vector<1x128xf32> -> vector<32x128xf32>
    %c15_i32 = arith.constant 15 : i32
    %37 = vector.broadcast %c15_i32 : i32 to vector<32x1xi32>
    %38 = arith.cmpi slt, %17, %37 : vector<32x1xi32>
    %39 = arith.extui %38 : vector<32x1xi1> to vector<32x1xi32>
    %40 = arith.sitofp %39 : vector<32x1xi32> to vector<32x1xf32>
    %41 = vector.broadcast %40 : vector<32x1xf32> to vector<32x128xf32>
    %42 = arith.mulf %36, %41 : vector<32x128xf32>
    %c2 = arith.constant 2 : index
    %c0_13 = arith.constant 0 : index
    %c0_14 = arith.constant 0 : index
    %43 = vector.load %arg2[%c2, %c0_13, %c0_14] : memref<3x128x128xf32, #tpu.memory_space<vmem>>, vector<1x128x128xf32>
    %44 = vector.shape_cast %43 : vector<1x128x128xf32> to vector<128x128xf32>
    %cst_15 = arith.constant dense<0.000000e+00> : vector<32x128xf32>
    %45 = tpu.matmul %42, %44, %cst_15 {dimension_numbers = #tpu.dot_dimension_numbers<[1], [0], [0], [1], [0, 0, 1, 1], [], []>} : vector<32x128xf32>, vector<128x128xf32>, vector<32x128xf32> -> vector<32x128xf32>
    %46 = arith.addf %33, %45 : vector<32x128xf32>
    %cst_16 = arith.constant 0.000000e+00 : f32
    %47 = vector.broadcast %cst_16 : f32 to vector<32x128xf32>
    %48 = arith.maximumf %46, %47 : vector<32x128xf32>
    %cst_17 = arith.constant 0.000000e+00 : f32
    %49 = vector.broadcast %cst_17 : f32 to vector<1x128xf32>
    %50 = vector.extract_strided_slice %48 {offsets = [0, 0], sizes = [31, 128], strides = [1, 1]} : vector<32x128xf32> to vector<31x128xf32>
    %51 = tpu.concatenate %49, %50 in 0 : vector<1x128xf32>, vector<31x128xf32> -> vector<32x128xf32>
    %c1_i32_18 = arith.constant 1 : i32
    %52 = vector.broadcast %c1_i32_18 : i32 to vector<32x1xi32>
    %53 = arith.cmpi sge, %17, %52 : vector<32x1xi32>
    %54 = arith.extui %53 : vector<32x1xi1> to vector<32x1xi32>
    %55 = arith.sitofp %54 : vector<32x1xi32> to vector<32x1xf32>
    %56 = vector.broadcast %55 : vector<32x1xf32> to vector<32x128xf32>
    %57 = arith.mulf %51, %56 : vector<32x128xf32>
    %c0_19 = arith.constant 0 : index
    %c0_20 = arith.constant 0 : index
    %c0_21 = arith.constant 0 : index
    %58 = vector.load %arg3[%c0_19, %c0_20, %c0_21] : memref<3x128x128xf32, #tpu.memory_space<vmem>>, vector<1x128x128xf32>
    %59 = vector.shape_cast %58 : vector<1x128x128xf32> to vector<128x128xf32>
    %cst_22 = arith.constant dense<0.000000e+00> : vector<32x128xf32>
    %60 = tpu.matmul %57, %59, %cst_22 {dimension_numbers = #tpu.dot_dimension_numbers<[1], [0], [0], [1], [0, 0, 1, 1], [], []>} : vector<32x128xf32>, vector<128x128xf32>, vector<32x128xf32> -> vector<32x128xf32>
    %c1_23 = arith.constant 1 : index
    %c0_24 = arith.constant 0 : index
    %c0_25 = arith.constant 0 : index
    %61 = vector.load %arg3[%c1_23, %c0_24, %c0_25] : memref<3x128x128xf32, #tpu.memory_space<vmem>>, vector<1x128x128xf32>
    %62 = vector.shape_cast %61 : vector<1x128x128xf32> to vector<128x128xf32>
    %cst_26 = arith.constant dense<0.000000e+00> : vector<32x128xf32>
    %63 = tpu.matmul %48, %62, %cst_26 {dimension_numbers = #tpu.dot_dimension_numbers<[1], [0], [0], [1], [0, 0, 1, 1], [], []>} : vector<32x128xf32>, vector<128x128xf32>, vector<32x128xf32> -> vector<32x128xf32>
    %64 = arith.addf %60, %63 : vector<32x128xf32>
    %cst_27 = arith.constant 0.000000e+00 : f32
    %65 = vector.broadcast %cst_27 : f32 to vector<1x128xf32>
    %66 = vector.extract_strided_slice %48 {offsets = [1, 0], sizes = [31, 128], strides = [1, 1]} : vector<32x128xf32> to vector<31x128xf32>
    %67 = tpu.concatenate %66, %65 in 0 : vector<31x128xf32>, vector<1x128xf32> -> vector<32x128xf32>
    %c15_i32_28 = arith.constant 15 : i32
    %68 = vector.broadcast %c15_i32_28 : i32 to vector<32x1xi32>
    %69 = arith.cmpi slt, %17, %68 : vector<32x1xi32>
    %70 = arith.extui %69 : vector<32x1xi1> to vector<32x1xi32>
    %71 = arith.sitofp %70 : vector<32x1xi32> to vector<32x1xf32>
    %72 = vector.broadcast %71 : vector<32x1xf32> to vector<32x128xf32>
    %73 = arith.mulf %67, %72 : vector<32x128xf32>
    %c2_29 = arith.constant 2 : index
    %c0_30 = arith.constant 0 : index
    %c0_31 = arith.constant 0 : index
    %74 = vector.load %arg3[%c2_29, %c0_30, %c0_31] : memref<3x128x128xf32, #tpu.memory_space<vmem>>, vector<1x128x128xf32>
    %75 = vector.shape_cast %74 : vector<1x128x128xf32> to vector<128x128xf32>
    %cst_32 = arith.constant dense<0.000000e+00> : vector<32x128xf32>
    %76 = tpu.matmul %73, %75, %cst_32 {dimension_numbers = #tpu.dot_dimension_numbers<[1], [0], [0], [1], [0, 0, 1, 1], [], []>} : vector<32x128xf32>, vector<128x128xf32>, vector<32x128xf32> -> vector<32x128xf32>
    %77 = arith.addf %64, %76 : vector<32x128xf32>
    %cst_33 = arith.constant 0xFF800000 : f32
    %78 = vector.broadcast %cst_33 : f32 to vector<32x1xf32>
    %79 = vector.extract_strided_slice %77 {offsets = [0, 1], sizes = [32, 127], strides = [1, 1]} : vector<32x128xf32> to vector<32x127xf32>
    %80 = tpu.concatenate %79, %78 in 1 : vector<32x127xf32>, vector<32x1xf32> -> vector<32x128xf32>
    %81 = arith.maximumf %77, %80 : vector<32x128xf32>
    %cst_34 = arith.constant 0xFF800000 : f32
    %82 = vector.broadcast %cst_34 : f32 to vector<32x2xf32>
    %83 = vector.extract_strided_slice %81 {offsets = [0, 2], sizes = [32, 126], strides = [1, 1]} : vector<32x128xf32> to vector<32x126xf32>
    %84 = tpu.concatenate %83, %82 in 1 : vector<32x126xf32>, vector<32x2xf32> -> vector<32x128xf32>
    %85 = arith.maximumf %81, %84 : vector<32x128xf32>
    %cst_35 = arith.constant 0xFF800000 : f32
    %86 = vector.broadcast %cst_35 : f32 to vector<32x4xf32>
    %87 = vector.extract_strided_slice %85 {offsets = [0, 4], sizes = [32, 124], strides = [1, 1]} : vector<32x128xf32> to vector<32x124xf32>
    %88 = tpu.concatenate %87, %86 in 1 : vector<32x124xf32>, vector<32x4xf32> -> vector<32x128xf32>
    %89 = arith.maximumf %85, %88 : vector<32x128xf32>
    %90 = tpu.concatenate %77, %89 in 1 : vector<32x128xf32>, vector<32x128xf32> -> vector<32x256xf32>
    %c0_36 = arith.constant 0 : index
    %c0_37 = arith.constant 0 : index
    %91 = vector.load %arg5[%c0_36, %c0_37] : memref<256x32xf32, #tpu.memory_space<vmem>>, vector<256x32xf32>
    %cst_38 = arith.constant dense<0.000000e+00> : vector<32x32xf32>
    %92 = tpu.matmul %90, %91, %cst_38 {dimension_numbers = #tpu.dot_dimension_numbers<[1], [0], [0], [1], [0, 0, 1, 1], [], []>} : vector<32x256xf32>, vector<256x32xf32>, vector<32x32xf32> -> vector<32x32xf32>
    %cst_39 = arith.constant 0.000000e+00 : f32
    %93 = vector.broadcast %cst_39 : f32 to vector<3x32xf32>
    %94 = vector.extract_strided_slice %92 {offsets = [0, 0], sizes = [29, 32], strides = [1, 1]} : vector<32x32xf32> to vector<29x32xf32>
    %95 = tpu.concatenate %93, %94 in 0 : vector<3x32xf32>, vector<29x32xf32> -> vector<32x32xf32>
    %c3_i32 = arith.constant 3 : i32
    %96 = vector.broadcast %c3_i32 : i32 to vector<32x1xi32>
    %97 = arith.cmpi sge, %17, %96 : vector<32x1xi32>
    %98 = arith.extui %97 : vector<32x1xi1> to vector<32x1xi32>
    %99 = arith.sitofp %98 : vector<32x1xi32> to vector<32x1xf32>
    %100 = vector.broadcast %99 : vector<32x1xf32> to vector<32x32xf32>
    %101 = arith.mulf %95, %100 : vector<32x32xf32>
    %c0_40 = arith.constant 0 : index
    %c0_41 = arith.constant 0 : index
    %c0_42 = arith.constant 0 : index
    %102 = vector.load %arg4[%c0_40, %c0_41, %c0_42] : memref<7x32x128xf32, #tpu.memory_space<vmem>>, vector<1x32x128xf32>
    %103 = vector.shape_cast %102 : vector<1x32x128xf32> to vector<32x128xf32>
    %cst_43 = arith.constant dense<0.000000e+00> : vector<32x128xf32>
    %104 = tpu.matmul %101, %103, %cst_43 {dimension_numbers = #tpu.dot_dimension_numbers<[1], [0], [0], [1], [0, 0, 1, 1], [], []>} : vector<32x32xf32>, vector<32x128xf32>, vector<32x128xf32> -> vector<32x128xf32>
    %cst_44 = arith.constant 0.000000e+00 : f32
    %105 = vector.broadcast %cst_44 : f32 to vector<2x32xf32>
    %106 = vector.extract_strided_slice %92 {offsets = [0, 0], sizes = [30, 32], strides = [1, 1]} : vector<32x32xf32> to vector<30x32xf32>
    %107 = tpu.concatenate %105, %106 in 0 : vector<2x32xf32>, vector<30x32xf32> -> vector<32x32xf32>
    %c2_i32 = arith.constant 2 : i32
    %108 = vector.broadcast %c2_i32 : i32 to vector<32x1xi32>
    %109 = arith.cmpi sge, %17, %108 : vector<32x1xi32>
    %110 = arith.extui %109 : vector<32x1xi1> to vector<32x1xi32>
    %111 = arith.sitofp %110 : vector<32x1xi32> to vector<32x1xf32>
    %112 = vector.broadcast %111 : vector<32x1xf32> to vector<32x32xf32>
    %113 = arith.mulf %107, %112 : vector<32x32xf32>
    %c1_45 = arith.constant 1 : index
    %c0_46 = arith.constant 0 : index
    %c0_47 = arith.constant 0 : index
    %114 = vector.load %arg4[%c1_45, %c0_46, %c0_47] : memref<7x32x128xf32, #tpu.memory_space<vmem>>, vector<1x32x128xf32>
    %115 = vector.shape_cast %114 : vector<1x32x128xf32> to vector<32x128xf32>
    %cst_48 = arith.constant dense<0.000000e+00> : vector<32x128xf32>
    %116 = tpu.matmul %113, %115, %cst_48 {dimension_numbers = #tpu.dot_dimension_numbers<[1], [0], [0], [1], [0, 0, 1, 1], [], []>} : vector<32x32xf32>, vector<32x128xf32>, vector<32x128xf32> -> vector<32x128xf32>
    %117 = arith.addf %104, %116 : vector<32x128xf32>
    %cst_49 = arith.constant 0.000000e+00 : f32
    %118 = vector.broadcast %cst_49 : f32 to vector<1x32xf32>
    %119 = vector.extract_strided_slice %92 {offsets = [0, 0], sizes = [31, 32], strides = [1, 1]} : vector<32x32xf32> to vector<31x32xf32>
    %120 = tpu.concatenate %118, %119 in 0 : vector<1x32xf32>, vector<31x32xf32> -> vector<32x32xf32>
    %c1_i32_50 = arith.constant 1 : i32
    %121 = vector.broadcast %c1_i32_50 : i32 to vector<32x1xi32>
    %122 = arith.cmpi sge, %17, %121 : vector<32x1xi32>
    %123 = arith.extui %122 : vector<32x1xi1> to vector<32x1xi32>
    %124 = arith.sitofp %123 : vector<32x1xi32> to vector<32x1xf32>
    %125 = vector.broadcast %124 : vector<32x1xf32> to vector<32x32xf32>
    %126 = arith.mulf %120, %125 : vector<32x32xf32>
    %c2_51 = arith.constant 2 : index
    %c0_52 = arith.constant 0 : index
    %c0_53 = arith.constant 0 : index
    %127 = vector.load %arg4[%c2_51, %c0_52, %c0_53] : memref<7x32x128xf32, #tpu.memory_space<vmem>>, vector<1x32x128xf32>
    %128 = vector.shape_cast %127 : vector<1x32x128xf32> to vector<32x128xf32>
    %cst_54 = arith.constant dense<0.000000e+00> : vector<32x128xf32>
    %129 = tpu.matmul %126, %128, %cst_54 {dimension_numbers = #tpu.dot_dimension_numbers<[1], [0], [0], [1], [0, 0, 1, 1], [], []>} : vector<32x32xf32>, vector<32x128xf32>, vector<32x128xf32> -> vector<32x128xf32>
    %130 = arith.addf %117, %129 : vector<32x128xf32>
    %c3 = arith.constant 3 : index
    %c0_55 = arith.constant 0 : index
    %c0_56 = arith.constant 0 : index
    %131 = vector.load %arg4[%c3, %c0_55, %c0_56] : memref<7x32x128xf32, #tpu.memory_space<vmem>>, vector<1x32x128xf32>
    %132 = vector.shape_cast %131 : vector<1x32x128xf32> to vector<32x128xf32>
    %cst_57 = arith.constant dense<0.000000e+00> : vector<32x128xf32>
    %133 = tpu.matmul %92, %132, %cst_57 {dimension_numbers = #tpu.dot_dimension_numbers<[1], [0], [0], [1], [0, 0, 1, 1], [], []>} : vector<32x32xf32>, vector<32x128xf32>, vector<32x128xf32> -> vector<32x128xf32>
    %134 = arith.addf %130, %133 : vector<32x128xf32>
    %cst_58 = arith.constant 0.000000e+00 : f32
    %135 = vector.broadcast %cst_58 : f32 to vector<1x32xf32>
    %136 = vector.extract_strided_slice %92 {offsets = [1, 0], sizes = [31, 32], strides = [1, 1]} : vector<32x32xf32> to vector<31x32xf32>
    %137 = tpu.concatenate %136, %135 in 0 : vector<31x32xf32>, vector<1x32xf32> -> vector<32x32xf32>
    %c15_i32_59 = arith.constant 15 : i32
    %138 = vector.broadcast %c15_i32_59 : i32 to vector<32x1xi32>
    %139 = arith.cmpi slt, %17, %138 : vector<32x1xi32>
    %140 = arith.extui %139 : vector<32x1xi1> to vector<32x1xi32>
    %141 = arith.sitofp %140 : vector<32x1xi32> to vector<32x1xf32>
    %142 = vector.broadcast %141 : vector<32x1xf32> to vector<32x32xf32>
    %143 = arith.mulf %137, %142 : vector<32x32xf32>
    %c4 = arith.constant 4 : index
    %c0_60 = arith.constant 0 : index
    %c0_61 = arith.constant 0 : index
    %144 = vector.load %arg4[%c4, %c0_60, %c0_61] : memref<7x32x128xf32, #tpu.memory_space<vmem>>, vector<1x32x128xf32>
    %145 = vector.shape_cast %144 : vector<1x32x128xf32> to vector<32x128xf32>
    %cst_62 = arith.constant dense<0.000000e+00> : vector<32x128xf32>
    %146 = tpu.matmul %143, %145, %cst_62 {dimension_numbers = #tpu.dot_dimension_numbers<[1], [0], [0], [1], [0, 0, 1, 1], [], []>} : vector<32x32xf32>, vector<32x128xf32>, vector<32x128xf32> -> vector<32x128xf32>
    %147 = arith.addf %134, %146 : vector<32x128xf32>
    %cst_63 = arith.constant 0.000000e+00 : f32
    %148 = vector.broadcast %cst_63 : f32 to vector<2x32xf32>
    %149 = vector.extract_strided_slice %92 {offsets = [2, 0], sizes = [30, 32], strides = [1, 1]} : vector<32x32xf32> to vector<30x32xf32>
    %150 = tpu.concatenate %149, %148 in 0 : vector<30x32xf32>, vector<2x32xf32> -> vector<32x32xf32>
    %c14_i32 = arith.constant 14 : i32
    %151 = vector.broadcast %c14_i32 : i32 to vector<32x1xi32>
    %152 = arith.cmpi slt, %17, %151 : vector<32x1xi32>
    %153 = arith.extui %152 : vector<32x1xi1> to vector<32x1xi32>
    %154 = arith.sitofp %153 : vector<32x1xi32> to vector<32x1xf32>
    %155 = vector.broadcast %154 : vector<32x1xf32> to vector<32x32xf32>
    %156 = arith.mulf %150, %155 : vector<32x32xf32>
    %c5 = arith.constant 5 : index
    %c0_64 = arith.constant 0 : index
    %c0_65 = arith.constant 0 : index
    %157 = vector.load %arg4[%c5, %c0_64, %c0_65] : memref<7x32x128xf32, #tpu.memory_space<vmem>>, vector<1x32x128xf32>
    %158 = vector.shape_cast %157 : vector<1x32x128xf32> to vector<32x128xf32>
    %cst_66 = arith.constant dense<0.000000e+00> : vector<32x128xf32>
    %159 = tpu.matmul %156, %158, %cst_66 {dimension_numbers = #tpu.dot_dimension_numbers<[1], [0], [0], [1], [0, 0, 1, 1], [], []>} : vector<32x32xf32>, vector<32x128xf32>, vector<32x128xf32> -> vector<32x128xf32>
    %160 = arith.addf %147, %159 : vector<32x128xf32>
    %cst_67 = arith.constant 0.000000e+00 : f32
    %161 = vector.broadcast %cst_67 : f32 to vector<3x32xf32>
    %162 = vector.extract_strided_slice %92 {offsets = [3, 0], sizes = [29, 32], strides = [1, 1]} : vector<32x32xf32> to vector<29x32xf32>
    %163 = tpu.concatenate %162, %161 in 0 : vector<29x32xf32>, vector<3x32xf32> -> vector<32x32xf32>
    %c13_i32 = arith.constant 13 : i32
    %164 = vector.broadcast %c13_i32 : i32 to vector<32x1xi32>
    %165 = arith.cmpi slt, %17, %164 : vector<32x1xi32>
    %166 = arith.extui %165 : vector<32x1xi1> to vector<32x1xi32>
    %167 = arith.sitofp %166 : vector<32x1xi32> to vector<32x1xf32>
    %168 = vector.broadcast %167 : vector<32x1xf32> to vector<32x32xf32>
    %169 = arith.mulf %163, %168 : vector<32x32xf32>
    %c6 = arith.constant 6 : index
    %c0_68 = arith.constant 0 : index
    %c0_69 = arith.constant 0 : index
    %170 = vector.load %arg4[%c6, %c0_68, %c0_69] : memref<7x32x128xf32, #tpu.memory_space<vmem>>, vector<1x32x128xf32>
    %171 = vector.shape_cast %170 : vector<1x32x128xf32> to vector<32x128xf32>
    %cst_70 = arith.constant dense<0.000000e+00> : vector<32x128xf32>
    %172 = tpu.matmul %169, %171, %cst_70 {dimension_numbers = #tpu.dot_dimension_numbers<[1], [0], [0], [1], [0, 0, 1, 1], [], []>} : vector<32x32xf32>, vector<32x128xf32>, vector<32x128xf32> -> vector<32x128xf32>
    %173 = arith.addf %160, %172 : vector<32x128xf32>
    %174 = arith.negf %173 : vector<32x128xf32>
    %175 = math.exp %174 : vector<32x128xf32>
    %cst_71 = arith.constant 1.000000e+00 : f32
    %176 = vector.broadcast %cst_71 : f32 to vector<32x128xf32>
    %177 = arith.addf %176, %175 : vector<32x128xf32>
    %178 = arith.divf %176, %177 : vector<32x128xf32>
    %179 = arith.mulf %77, %178 : vector<32x128xf32>
    %180 = arith.addf %179, %0 : vector<32x128xf32>
    %c0_72 = arith.constant 0 : index
    %c0_73 = arith.constant 0 : index
    %181 = vector.load %arg6[%c0_72, %c0_73] : memref<32x128xf32, #tpu.memory_space<vmem>>, vector<32x128xf32>
    tpu.vector_store %arg6[%c0_72, %c0_73], %180 {strides = array<i32>} : memref<32x128xf32, #tpu.memory_space<vmem>>, vector<32x128xf32>,
    return
  }
  func.func @transform_0(%arg0: i32) -> (i32, i32) {
    %c0_i32 = arith.constant 0 : i32
    %c0_i32_0 = arith.constant 0 : i32
    return %arg0, %c0_i32 : i32, i32
  }
  func.func @transform_1(%arg0: i32) -> (i32, i32, i32) {
    %c0_i32 = arith.constant 0 : i32
    %c0_i32_0 = arith.constant 0 : i32
    %c0_i32_1 = arith.constant 0 : i32
    %c0_i32_2 = arith.constant 0 : i32
    return %c0_i32, %c0_i32_0, %c0_i32_1 : i32, i32, i32
  }
  func.func @transform_2(%arg0: i32) -> (i32, i32, i32) {
    %c0_i32 = arith.constant 0 : i32
    %c0_i32_0 = arith.constant 0 : i32
    %c0_i32_1 = arith.constant 0 : i32
    %c0_i32_2 = arith.constant 0 : i32
    return %c0_i32, %c0_i32_0, %c0_i32_1 : i32, i32, i32
  }
  func.func @transform_3(%arg0: i32) -> (i32, i32, i32) {
    %c0_i32 = arith.constant 0 : i32
    %c0_i32_0 = arith.constant 0 : i32
    %c0_i32_1 = arith.constant 0 : i32
    %c0_i32_2 = arith.constant 0 : i32
    return %c0_i32, %c0_i32_0, %c0_i32_1 : i32, i32, i32
  }
  func.func @transform_4(%arg0: i32) -> (i32, i32) {
    %c0_i32 = arith.constant 0 : i32
    %c0_i32_0 = arith.constant 0 : i32
    %c0_i32_1 = arith.constant 0 : i32
    return %c0_i32, %c0_i32_0 : i32, i32
  }
  func.func @transform_5(%arg0: i32) -> (i32, i32) {
    %c0_i32 = arith.constant 0 : i32
    %c0_i32_0 = arith.constant 0 : i32
    return %arg0, %c0_i32 : i32, i32
  }
}

</mosaic_0001>

<bundles_post_ra>
// kernel: tpu_custom_call.1
= control target key start
LH: loop header
LB: loop body
LE: loop exit
PB: predicated region body
PF: predicated region fallthrough
CT: control target
= control target key end

     0   :  { %10 = vsyncpa [#allocation3], 0  ;;  %s2437_s0 = inlined_call_operand.vmem [shape: f32[64,128], index: 0, kind: input, shape index: {}]   ;;  %s2438_s1 = inlined_call_operand.hbm [shape: f32[3,128,128], index: 1, kind: input, shape index: {}]   ;;  %s2439_s2 = inlined_call_operand.hbm [shape: f32[3,128,128], index: 2, kind: input, shape index: {}]   ;;  %s2440_s3 = inlined_call_operand.vmem [shape: f32[7,32,128], index: 3, kind: input, shape index: {}]   ;;  %s2441_s4 = inlined_call_operand.vmem [shape: f32[256,32], index: 4, kind: input, shape index: {}]   ;;  %s2442_s5 = inlined_call_operand.hbm [shape: f32[64,128], index: 5, kind: output, shape index: {}]  }
   0x1   :  { %11 = vsyncpa [#allocation6], 0 }
   0x2   :  { %12 = vsyncpa [#allocation4], 0 }
   0x3   :  { %14 = vsyncpa [#allocation4 + $0x1], 0  ;;  %s1913_s18 = smov 0   ;;  %s1915_s19 = smov 0  }
   0x4   :  { %s1917_s20 = smov 0   ;;  %s1919_s21 = smov 0  }
   0x5 LB: > { %s1934_s22 = sadd.s32 4294967295, %s1871_s21   ;;  %s1544_s23 = sadd.s32 4294967294, %s1871_s21   ;;  %s1871_s21 = sphi %s1919_s21, %s2449_s21   ;;  %s1867_s20 = sphi %s1917_s20, %s2448_s20   ;;  %s1863_s19 = sphi %s1915_s19, %s2447_s19   ;;  %s1859_s18 = sphi %s1913_s18, %s2446_s18  }
   0x6   : > { %s1938_s24 = sadd.s32 1, %s1871_s21   ;;  %s137_s25 = sadd.s32 1, %s1867_s20 }
   0x7   : > { %s134_s26 = ssub.s32 %s1871_s21, %s1938_s24  ;;  %p147_p0 = scmp.ne.s32.totalorder %s1867_s20, %s1863_s19 }
   0x8   : > { %p135_p1 = scmp.eq.s32.totalorder %s134_s26, 0  ;;  %p148_p2 = scmp.eq.s32.totalorder %s1934_s22, 1 }
   0x9   : > { %p153_p3 = scmp.ne.s32.totalorder %s1863_s19, %s1859_s18  ;;  %p154_p4 = scmp.eq.s32.totalorder %s1544_s23, 1 }
   0xa   : > { %s1949_s27 = scalar_select %p135_p1, %s1867_s20, %s137_s25  }
   0xb   : > { %p1951_p5 = por %p148_p2, %p147_p0  ;;  %p1955_p6 = por %p154_p4, %p153_p3 }
   0xc   : > { %p1545_p7 = scmp.ge.s32.totalorder %s1871_s21, 1  ;;  %p161_p8 = scmp.lt.s32.totalorder %s1871_s21, 3 }
   0xd   : > { %p1674_p9 = scmp.eq.s32.totalorder %s1934_s22, 0  ;;  %s172_s8 = sshll.u32 %s2438_s1, 4  ;;  %s173_s8 = int_to_ptr.hbm [resolvable:$true] %s172_s8 }
   0xe   : > { %p1962_p10 = pnand %p1545_p7, %p161_p8  ;;  %s1873_s9 = smov [#allocation2]  }
   0xf   : > { %s174_s10 = sshll.u32 %s1873_s9, 4  ;;  %s186_s13 = sshll.u32 %s2439_s2, 4  ;;  %s175_s10 = int_to_ptr.vmem [resolvable:$true] %s174_s10  ;;  %s187_s13 = int_to_ptr.hbm [resolvable:$true] %s186_s13 }
  0x10   : > { %p1663_p11 = pneg %p1962_p10  ;;  %s1874_s14 = smov 128  }
  0x11   : > { %s1875_s15 = smov 8   ;;  %s1876_s16 = smov [#allocation5]  }
  0x12   : > { %p1664_p12 = pnand %p1674_p9, %p1663_p11  ;;  %s188_s17 = sshll.u32 %s1876_s16, 4  ;;  %s189_s17 = int_to_ptr.vmem [resolvable:$true] %s188_s17 }
  0x13   : > { %219 = sbr.rel (%p1962_p10) target bundleno = 1061 (0x425), region = 40 }
  0x14   : > { %1666 = dma.hbm_to_vmem [thread:$0]  (!%p1664_p12), %s173_s8, 6144, %s175_s10, [#allocation3], %s1874_s14, %s1874_s14, %s1875_s15  }
  0x15   : > { %1669 = dma.hbm_to_vmem [thread:$0]  (!%p1664_p12), %s187_s13, 6144, %s189_s17, [#allocation6], %s1874_s14, %s1874_s14, %s1875_s15  }
  0x18   : > { %1846 = dma.done.wait (%p1674_p9), [#allocation3], 6144  }
  0x19   : > { %1848 = vsyncadd (%p1674_p9), [#allocation3], 4294961152 }
  0x1a   : > { %1850 = dma.done.wait (%p1674_p9), [#allocation6], 6144  }
  0x1b   : > { %1852 = vsyncadd (%p1674_p9), [#allocation6], 4294961152  ;;  %v486_v0 = vld [vmem:[#allocation2 + $0x178] sm:$0xff]  ;;  %v485_v1 = vld [vmem:[#allocation2 + $0x170] sm:$0xff]  ;;  %s1553_s23 = sshll.u32 %s1934_s22, 2  ;;  %v264_v21 = vlaneseq  ;;  %vm321_vm0 = vcmask 1040384  }
  0x1c   : > { %v382_v2 = vld [vmem:[#allocation2 + $0xf8] sm:$0xff]  ;;  %487 = vmatpush.msra.mxu2 %v486_v0  ;;  %v381_v4 = vld [vmem:[#allocation2 + $0xf0] sm:$0xff]  ;;  %v484_v5 = vld [vmem:[#allocation2 + $0x168] sm:$0xff]  ;;  %p254_p13 = scmp.lt.s32.totalorder %s1553_s23, 7  ;;  %vm441_vm2 = vcmask 1046528   ;;  %v1877_v56 = vmov 0.0  }
  0x1d   : > { %383 = vmatpush.msra.mxu0 %v382_v2  ;;  %v365_v3 = vld [vmem:[#allocation2 + $0x78] sm:$0xff]  ;;  %v364_v6 = vld [vmem:[#allocation2 + $0x70] sm:$0xff]  ;;  %v380_v7 = vld [vmem:[#allocation2 + $0xe8] sm:$0xff]  ;;  %v1987_v28 = vshrl.u32 %v264_v21, 7  ;;  %s1878_s9 = smov 127   ;;  %vm717_vm6 = vcmask 1039360  }
  0x1e   : > { %412 = vmatpush.msra.mxu1 %v365_v3  ;;  %488 = vmatpush.msra.mxu2 %v485_v1  ;;  %v363_v8 = vld [vmem:[#allocation2 + $0x68] sm:$0xff]  ;;  %v483_v9 = vld [vmem:[#allocation2 + $0x160] sm:$0xff]  ;;  %v482_v12 = vld [vmem:[#allocation2 + $0x158] sm:$0xff]  ;;  %s2451_s23 = smov (!%p254_p13, %s1553_s23), 7  ;;  %s1879_s10 = smov 126   ;;  %vm742_vm7 = vcmask 1031168  }
  0x1f   : > { %384 = vmatpush.msra.mxu0 %v381_v4  ;;  %v379_v10 = vld [vmem:[#allocation2 + $0xe0] sm:$0xff]  ;;  %v378_v13 = vld [vmem:[#allocation2 + $0xd8] sm:$0xff]  ;;  %v481_v15 = vld [vmem:[#allocation2 + $0x150] sm:$0xff]  ;;  %s1554_s25 = sshll.u32 %s2451_s23, 3  ;;  %v1995_v35 = vand.u32 15, %v1987_v28  ;;  %v266_v44 = vadd.s32 8, %v1987_v28 }
  0x20   : > { %413 = vmatpush.msra.mxu1 %v364_v6  ;;  %489 = vmatpush.msra.mxu2 %v484_v5  ;;  %v362_v11 = vld [vmem:[#allocation2 + $0x60] sm:$0xff]  ;;  %v361_v14 = vld [vmem:[#allocation2 + $0x58] sm:$0xff]  ;;  %v377_v16 = vld [vmem:[#allocation2 + $0xd0] sm:$0xff]  ;;  %s1992_s6 = scalar_lea.vmem %s2437_s0, %s1554_s25  ;;  %v267_v4 = vadd.s32 16, %v1987_v28  ;;  %s1880_s30 = smov 124   ;;  %vm767_vm8 = vcmask 1014784  }
  0x21   : > { %385 = vmatpush.msra.mxu0 %v380_v7  ;;  %v360_v17 = vld [vmem:[#allocation2 + $0x50] sm:$0xff]  ;;  %v480_v18 = vld [vmem:[#allocation2 + $0x148] sm:$0xff]  ;;  %v479_v22 = vld [vmem:[#allocation2 + $0x140] sm:$0xff]  ;;  %vm334_vm1 = vcmp.ge.s32.totalorder %v1995_v35, 1  ;;  %v2019_v59 = vand.u32 15, %v266_v44  ;;  %vm883_vm9 = vcmp.ge.s32.totalorder %v1995_v35, 3 }
  0x22   : > { %414 = vmatpush.msra.mxu1 %v363_v8  ;;  %490 = vmatpush.msra.mxu2 %v483_v9  ;;  %v376_v19 = vld [vmem:[#allocation2 + $0xc8] sm:$0xff]  ;;  %v375_v23 = vld [vmem:[#allocation2 + $0xc0] sm:$0xff]  ;;  %v478_v25 = vld [vmem:[#allocation2 + $0x138] sm:$0xff]  ;;  %v2014_v57 = vsel %vm334_vm1, 1.0, %v1877_v56  ;;  %vm916_vm10 = vcmp.ge.s32.totalorder %v1995_v35, 2  ;;  %vm903_vm11 = vcmask 1041408  }
  0x23   : > { %386 = vmatpush.msra.mxu0 %v379_v10  ;;  %v359_v20 = vld [vmem:[#allocation2 + $0x48] sm:$0xff]  ;;  %v358_v24 = vld [vmem:[#allocation2 + $0x40] sm:$0xff]  ;;  %v374_v26 = vld [vmem:[#allocation2 + $0xb8] sm:$0xff]  ;;  %vm455_vm3 = vcmp.lt.s32.totalorder %v2019_v59, 15  ;;  %vm870_vm12 = vcmask 1042432   ;;  %vm937_vm13 = vcmask 261120  }
  0x24   : > { %415 = vmatpush.msra.mxu1 %v362_v11  ;;  %491 = vmatpush.msra.mxu2 %v482_v12  ;;  %v357_v27 = vld [vmem:[#allocation2 + $0x38] sm:$0xff]  ;;  %v477_v29 = vld [vmem:[#allocation2 + $0x130] sm:$0xff]  ;;  %v476_v32 = vld [vmem:[#allocation2 + $0x128] sm:$0xff]  ;;  %v2031_v9 = vsel %vm455_vm3, 1.0, %v1877_v56  ;;  %vm1198_vm1 = vcmask 1045504   ;;  %vm1277_vm3 = vcmask 1044480  }
  0x25   : > { %387 = vmatpush.msra.mxu0 %v378_v13  ;;  %v373_v30 = vld [vmem:[#allocation2 + $0xb0] sm:$0xff]  ;;  %v372_v33 = vld [vmem:[#allocation2 + $0xa8] sm:$0xff]  ;;  %v475_v36 = vld [vmem:[#allocation2 + $0x120] sm:$0xff]  ;;  %s250_s11 = sand.u32 1, %s1863_s19   ;;  %s1628_s14 = sshll.u32 %s1934_s22, 5 }
  0x26   : > { %416 = vmatpush.msra.mxu1 %v361_v14  ;;  %492 = vmatpush.msra.mxu2 %v481_v15  ;;  %v356_v31 = vld [vmem:[#allocation2 + $0x30] sm:$0xff]  ;;  %v355_v34 = vld [vmem:[#allocation2 + $0x28] sm:$0xff]  ;;  %v371_v37 = vld [vmem:[#allocation2 + $0xa0] sm:$0xff]  ;;  %v2036_v14 = vand.u32 15, %v267_v4  ;;  %s1552_s12 = sshll.u32 %s250_s11, 5  ;;  %s1456_s16 = scalar_lea.hbm %s2442_s5, %s1628_s14 }
  0x27   : > { %388 = vmatpush.msra.mxu0 %v377_v16  ;;  %v354_v38 = vld [vmem:[#allocation2 + $0x20] sm:$0xff]  ;;  %v474_v40 = vld [vmem:[#allocation2 + $0x118] sm:$0xff]  ;;  %v2001_v42 = vld [vmem:[%s1992_s6 + $0x8] sm:$0xff]  ;;  %s2391_s13 = scalar_lea.vmem [#allocation7], %s1552_s12  ;;  %s1459_s17 = sshll.u32 %s1456_s16, 4  ;;  %s1460_s17 = int_to_ptr.hbm [resolvable:$true] %s1459_s17 }
  0x28   : > { %417 = vmatpush.msra.mxu1 %v360_v17  ;;  %493 = vmatpush.msra.mxu2 %v480_v18  ;;  %v1998_v39 = vld [vmem:[%s1992_s6] sm:$0xff]  ;;  %v370_v41 = vld [vmem:[#allocation2 + $0x98] sm:$0xff]  ;;  %v473_v46 = vld [vmem:[#allocation2 + $0x110] sm:$0xff]  ;;  %v443_v50 = vrot.slane %v2001_v42, 1  ;;  %v323_v12 = vrot.slane %v2001_v42, 7  ;;  %vm336_vm4 = vcmp.ge.s32.totalorder %v2036_v14, 1 }
  0x29   : > { %389 = vmatpush.msra.mxu0 %v376_v19  ;;  %v322_v43 = vrot.slane %v1998_v39, 7  ;;  %v353_v45 = vld [vmem:[#allocation2 + $0x18] sm:$0xff]  ;;  %v369_v47 = vld [vmem:[#allocation2 + $0x90] sm:$0xff]  ;;  %v442_v49 = vrot.slane %v1998_v39, 1  ;;  %v472_v53 = vld [vmem:[#allocation2 + $0x108] sm:$0xff]  ;;  %vm918_vm14 = vcmp.ge.s32.totalorder %v2036_v14, 2 }
  0x2a   : > { %418 = vmatpush.msra.mxu1 %v359_v20  ;;  %494 = vmatpush.msra.mxu2 %v479_v22  ;;  %v352_v48 = vld [vmem:[#allocation2 + $0x10] sm:$0xff]  ;;  %v576_v51 = vld [vmem:[#allocation5 + $0xf8] sm:$0xff]  ;;  %v368_v54 = vld [vmem:[#allocation2 + $0x88] sm:$0xff]  ;;  %v268_v22 = vadd.s32 24, %v1987_v28  ;;  %vm885_vm15 = vcmp.ge.s32.totalorder %v2036_v14, 3  ;;  %s1457_s22 = sshll.u32 %s2391_s13, 4  ;;  %s1458_s22 = int_to_ptr.vmem [resolvable:$true] %s1457_s22 }
  0x2b   : > { %390 = vmatpush.msra.mxu0 %v375_v23  ;;  %v575_v52 = vld [vmem:[#allocation5 + $0xf0] sm:$0xff]  ;;  %v333_v55 = vsel %vm321_vm0, 0.0, %v322_v43  ;;  %577 = vmatpush.msra.mxu3 %v576_v51  ;;  %v351_v60 = vld [vmem:[#allocation2 + $0x8] sm:$0xff]  ;;  %v471_v62 = vld [vmem:[#allocation2 + $0x100] sm:$0xff]  ;;  %v444_v0 = vsel %vm441_vm2, %v442_v49, %v443_v50  ;;  %v324_v19 = vsel %vm321_vm0, %v322_v43, %v323_v12  ;;  %s1445_s23 = scalar_lea.sflag [#allocation4], %s250_s11  ;;  %s1815_s25 = sshra.s32 %s1460_s17, 4  ;;  %s1816_s25 = int_to_ptr.hbm [resolvable:$true] %s1815_s25 }
  0x2c   : > { %419 = vmatpush.msra.mxu1 %v358_v24  ;;  %495 = vmatpush.msra.mxu2 %v478_v25  ;;  %v2017_v58 = vld [vmem:[%s1992_s6 + $0x10] sm:$0xff]  ;;  %v574_v61 = vld [vmem:[#allocation5 + $0xe8] sm:$0xff]  ;;  %v367_v63 = vld [vmem:[#allocation2 + $0x80] sm:$0xff]  ;;  %v346_v2 = vmul.f32 %v2014_v57, %v333_v55  ;;  %v2053_v28 = vand.u32 15, %v268_v22  ;;  %s1817_s26 = scalar_lea.hbm %s1816_s25, 32  ;;  %p1822_p3 = scmp.lt.s32.totalorder %s1816_s25, %s2442_s5 }
  0x2d   : > { %391 = vmatpush.msra.mxu0 %v374_v26  ;;  %578 = vmatpush.msra.mxu3 %v575_v52  ;;  %v350_v1 = vld [vmem:[#allocation2] sm:$0xff]  ;;  %v445_v3 = vrot.slane %v2017_v58, 1  ;;  %v559_v5 = vld [vmem:[#allocation5 + $0x78] sm:$0xff]  ;;  %v558_v10 = vld [vmem:[#allocation5 + $0x70] sm:$0xff]  ;;  %v325_v21 = vrot.slane %v2017_v58, 7  ;;  %p1818_p0 = scmp.ne.s32.totalorder %s1816_s25, %s1817_s26 }
  0x2e   : > { %420 = vmatpush.msra.mxu1 %v357_v27  ;;  %496 = vmatpush.msra.mxu2 %v477_v29  ;;  %v573_v6 = vld [vmem:[#allocation5 + $0xe0] sm:$0xff]  ;;  %v2026_v7 = vld [vmem:[#allocation5 + $0x178] sm:$0xff]  ;;  %v2034_v13 = vld [vmem:[#allocation5 + $0x170] sm:$0xff]  ;;  %vm457_vm5 = vcmp.lt.s32.totalorder %v2053_v28, 15 }
  0x2f   : > { %392 = vmatpush.msra.mxu0 %v373_v30  ;;  %579 = vmatpush.msra.mxu3 %v574_v61  ;;  %v446_v8 = vsel %vm441_vm2, %v443_v50, %v445_v3  ;;  %v572_v11 = vld [vmem:[#allocation5 + $0xd8] sm:$0xff]  ;;  %v557_v15 = vld [vmem:[#allocation5 + $0x68] sm:$0xff]  ;;  %v571_v16 = vld [vmem:[#allocation5 + $0xd0] sm:$0xff]  ;;  %v326_v29 = vsel %vm321_vm0, %v323_v12, %v325_v21  ;;  %v2051_v30 = vsel %vm336_vm4, 1.0, %v1877_v56  ;;  %vm1214_vm4 = vcmp.lt.s32.totalorder %v2053_v28, 14  ;;  %p1819_p1 = pnand %p1818_p0, %p1951_p5 }
  0x30   : > { %421 = vmatpush.msra.mxu1 %v356_v31  ;;  %497 = vmatpush.msra.mxu2 %v476_v32  ;;  %v467_v17 = vmul.f32 %v2031_v9, %v446_v8  ;;  %v556_v18 = vld [vmem:[#allocation5 + $0x60] sm:$0xff]  ;;  %v263_v20 = vld [vmem:[%s1992_s6 + $0x18] sm:$0xff]  ;;  %v570_v23 = vld [vmem:[#allocation5 + $0xc8] sm:$0xff] }
  0x31   : > { %393 = vmatpush.msra.mxu0 %v372_v33  ;;  %580 = vmatpush.msra.mxu3 %v573_v6  ;;  %v555_v24 = vld [vmem:[#allocation5 + $0x58] sm:$0xff]  ;;  %v447_v25 = vrot.slane %v263_v20, 1  ;;  %v569_v26 = vld [vmem:[#allocation5 + $0xc0] sm:$0xff]  ;;  %v554_v27 = vld [vmem:[#allocation5 + $0x50] sm:$0xff]  ;;  %v327_v43 = vrot.slane %v263_v20, 7  ;;  %p1820_p2 = pneg %p1819_p1 }
  0x32   : > { %422 = vmatpush.msra.mxu1 %v355_v34  ;;  %498 = vmatpush.msra.mxu2 %v475_v36  ;;  %v568_v31 = vld [vmem:[#allocation5 + $0xb8] sm:$0xff]  ;;  %v553_v32 = vld [vmem:[#allocation5 + $0x48] sm:$0xff]  ;;  %v348_v34 = vmul.f32 %v2051_v30, %v326_v29  ;;  %v567_v36 = vld [vmem:[#allocation5 + $0xb0] sm:$0xff] }
  0x33   : > { %394 = vmatpush.msra.mxu0 %v371_v37  ;;  %581 = vmatpush.msra.mxu3 %v572_v11  ;;  %v448_v33 = vsel %vm441_vm2, %v445_v3, %v447_v25  ;;  %v552_v37 = vld [vmem:[#allocation5 + $0x40] sm:$0xff]  ;;  %v550_v44 = vld [vmem:[#allocation5 + $0x30] sm:$0xff]  ;;  %v665_v49 = vld [vmem:[#allocation5 + $0x168] sm:$0xff] }
  0x34   : > { %423 = vmatpush.msra.mxu1 %v354_v38  ;;  %499 = vmatpush.msra.mxu2 %v474_v40  ;;  %v566_v38 = vld [vmem:[#allocation5 + $0xa8] sm:$0xff]  ;;  %v2061_v40 = vsel %vm457_vm5, 1.0, %v1877_v56  ;;  %v563_v50 = vld [vmem:[#allocation5 + $0x90] sm:$0xff]  ;;  %v548_v51 = vld [vmem:[#allocation5 + $0x20] sm:$0xff]  ;;  %vm1293_vm5 = vcmp.lt.s32.totalorder %v2053_v28, 13 }
  0x35   : > { %395 = vmatpush.msra.mxu0 %v370_v41  ;;  %582 = vmatpush.msra.mxu3 %v571_v16  ;;  %v551_v41 = vld [vmem:[#allocation5 + $0x38] sm:$0xff]  ;;  %v664_v52 = vld [vmem:[#allocation5 + $0x160] sm:$0xff]  ;;  %v662_v61 = vld [vmem:[#allocation5 + $0x150] sm:$0xff] }
  0x36   : > { %424 = vmatpush.msra.mxu1 %v353_v45  ;;  %500 = vmatpush.msra.mxu2 %v473_v46  ;;  %v328_v46 = vsel %vm321_vm0, %v325_v21, %v327_v43  ;;  %v663_v55 = vld [vmem:[#allocation5 + $0x158] sm:$0xff]  ;;  %v658_v3 = vld [vmem:[#allocation5 + $0x130] sm:$0xff]  ;;  %v657_v4 = vld [vmem:[#allocation5 + $0x128] sm:$0xff] }
  0x37   : > { %396 = vmatpush.msra.mxu0 %v369_v47  ;;  %583 = vmatpush.msra.mxu3 %v570_v23  ;;  %v564_v47 = vld [vmem:[#allocation5 + $0x98] sm:$0xff]  ;;  %v654_v8 = vld [vmem:[#allocation5 + $0x110] sm:$0xff] }
  0x38   : > { %425 = vmatpush.msra.mxu1 %v352_v48  ;;  %501 = vmatpush.msra.mxu2 %v472_v53  ;;  %v549_v48 = vld [vmem:[#allocation5 + $0x28] sm:$0xff]  ;;  %v655_v6 = vld [vmem:[#allocation5 + $0x118] sm:$0xff] }
  0x39   : > { %397 = vmatpush.msra.mxu0 %v368_v54  ;;  %584 = vmatpush.msra.mxu3 %v569_v26  ;;  %v562_v53 = vld [vmem:[#allocation5 + $0x88] sm:$0xff]  ;;  %v547_v54 = vld [vmem:[#allocation5 + $0x18] sm:$0xff] }
  0x3a   : > { %426 = vmatpush.msra.mxu1 %v351_v60  ;;  %502 = vmatpush.msra.mxu2 %v471_v62  ;;  %v546_v60 = vld [vmem:[#allocation5 + $0x10] sm:$0xff]  ;;  %v545_v62 = vld [vmem:[#allocation5 + $0x8] sm:$0xff] }
  0x3b   : > { %398 = vmatpush.msra.mxu0 %v367_v63  ;;  %503 = vmatmul.f32.vlgmr.msra.gmra.mxu2 %v444_v0  ;;  %v661_v63 = vld [vmem:[#allocation5 + $0x148] sm:$0xff]  ;;  %v544_v0 = vld [vmem:[#allocation5] sm:$0xff] }
  0x3c   : > { %427 = vmatpush.msra.mxu1 %v350_v1  ;;  %399 = vmatmul.f32.vlgmr.msra.gmra.mxu0 %v1998_v39  ;;  %v453_v39 = vsel %vm441_vm2, %v447_v25, 0.0  ;;  %v660_v1 = vld [vmem:[#allocation5 + $0x140] sm:$0xff] }
  0x3d   : > { %428 = vmatmul.f32.vlgmr.msra.gmra.mxu1 %v346_v2  ;;  %606 = vmatpush.msrb.mxu0 %v559_v5  ;;  %v469_v45 = vmul.f32 %v2061_v40, %v453_v39  ;;  %v659_v2 = vld [vmem:[#allocation5 + $0x138] sm:$0xff]  ;;  %v656_v5 = vld [vmem:[#allocation5 + $0x120] sm:$0xff] }
  0x3e   : > { %1629 = vmatpush.msrb.mxu1 %v2026_v7  ;;  %585 = vmatpush.msra.mxu3 %v568_v31 }
  0x3f   : > { %607 = vmatpush.msrb.mxu0 %v558_v10  ;;  %v653_v10 = vld [vmem:[#allocation5 + $0x108] sm:$0xff] }
  0x40   : > { %1630 = vmatpush.msrb.mxu1 %v2034_v13  ;;  %586 = vmatpush.msra.mxu3 %v567_v36 }
  0x41   : > { %608 = vmatpush.msrb.mxu0 %v557_v15 }
  0x42   : > { %587 = vmatpush.msra.mxu3 %v566_v38  ;;  %1631 = vmatpush.msrb.mxu1 %v665_v49 }
  0x43   : > { %506 = vmatmul.f32.gmra.mxu2 %v467_v17  ;;  %609 = vmatpush.msrb.mxu0 %v556_v18 }
  0x44   : > { %402 = vmatmul.f32.gmra.mxu0 %v2001_v42  ;;  %v565_v42 = vld [vmem:[#allocation5 + $0xa0] sm:$0xff]  ;;  %1632 = vmatpush.msrb.mxu1 %v664_v52 }
  0x45   : > { %431 = vmatmul.f32.gmra.mxu1 %v324_v19  ;;  %610 = vmatpush.msrb.mxu0 %v555_v24 }
  0x46   : > { %588 = vmatpush.msra.mxu3 %v565_v42  ;;  %1633 = vmatpush.msrb.mxu1 %v663_v55 }
  0x47   : > { %611 = vmatpush.msrb.mxu0 %v554_v27 }
  0x48   : > { %589 = vmatpush.msra.mxu3 %v564_v47  ;;  %1634 = vmatpush.msrb.mxu1 %v662_v61 }
  0x49   : > { %612 = vmatpush.msrb.mxu0 %v553_v32 }
  0x4a   : > { %590 = vmatpush.msra.mxu3 %v563_v50  ;;  %1635 = vmatpush.msrb.mxu1 %v661_v63 }
  0x4b   : > { %509 = vmatmul.f32.gmra.mxu2 %v448_v33  ;;  %613 = vmatpush.msrb.mxu0 %v552_v37 }
  0x4c   : > { %405 = vmatmul.f32.gmra.mxu0 %v2017_v58  ;;  %591 = vmatpush.msra.mxu3 %v562_v53  ;;  %v561_v58 = vld [vmem:[#allocation5 + $0x80] sm:$0xff] }
  0x4d   : > { %434 = vmatmul.f32.gmra.mxu1 %v348_v34  ;;  %614 = vmatpush.msrb.mxu0 %v551_v41 }
  0x4e   : > { %592 = vmatpush.msra.mxu3 %v561_v58  ;;  %1636 = vmatpush.msrb.mxu1 %v660_v1 }
  0x4f   : > { %615 = vmatpush.msrb.mxu0 %v550_v44 }
  0x50   : > { %1637 = vmatpush.msrb.mxu1 %v659_v2 }
  0x51   : > { %616 = vmatpush.msrb.mxu0 %v549_v48 }
  0x52   : > { %1638 = vmatpush.msrb.mxu1 %v658_v3 }
  0x53   : > { %512 = vmatmul.f32.gmra.mxu2 %v469_v45  ;;  %617 = vmatpush.msrb.mxu0 %v548_v51 }
  0x54   : > { %408 = vmatmul.f32.gmra.mxu0 %v263_v20  ;;  %1639 = vmatpush.msrb.mxu1 %v657_v4 }
  0x55   : > { %437 = vmatmul.f32.gmra.mxu1 %v328_v46  ;;  %618 = vmatpush.msrb.mxu0 %v547_v54 }
  0x56   : > { %1640 = vmatpush.msrb.mxu1 %v656_v5 }
  0x57   : > { %619 = vmatpush.msrb.mxu0 %v546_v60 }
  0x58   : > { %1641 = vmatpush.msrb.mxu1 %v655_v6 }
  0x59   : > { %620 = vmatpush.msrb.mxu0 %v545_v62 }
  0x5a   : > { %1642 = vmatpush.msrb.mxu1 %v654_v8 }
  0x5b   : > { %621 = vmatpush.msrb.mxu0 %v544_v0  ;;  %v790_v0 = vld [vmem:[%s2441_s4 + $0x70] sm:$0xff] }
  0x5c   : > { %1643 = vmatpush.msrb.mxu1 %v653_v10 }
  0x5d   : > { %668 = vmatpush.msra.mxu0 %v2026_v7  ;;  %v652_v7 = vld [vmem:[#allocation5 + $0x100] sm:$0xff] }
  0x5e   : > { %1644 = vmatpush.msrb.mxu1 %v652_v7 }
  0x5f   : > { %669 = vmatpush.msra.mxu0 %v2034_v13 }
  0x61   : > { %670 = vmatpush.msra.mxu0 %v665_v49 }
  0x63   : > { %671 = vmatpush.msra.mxu0 %v664_v52 }
  0x65   : > { %672 = vmatpush.msra.mxu0 %v663_v55 }
  0x67   : > { %673 = vmatpush.msra.mxu0 %v662_v61 }
  0x69   : > { %674 = vmatpush.msra.mxu0 %v661_v63  ;;  %v791_v63 = vld [vmem:[%s2441_s4 + $0x78] sm:$0xff] }
  0x6a   : > { %808 = vmatpush.msrb.mxu2 %v791_v63  ;;  %v803_v63 = vld [vmem:[%s2441_s4 + $0xd8] sm:$0xff] }
  0x6b   : > { %675 = vmatpush.msra.mxu0 %v660_v1  ;;  %v789_v1 = vld [vmem:[%s2441_s4 + $0x68] sm:$0xff] }
  0x6c   : > { %809 = vmatpush.msrb.mxu2 %v790_v0  ;;  %v802_v0 = vld [vmem:[%s2441_s4 + $0xd0] sm:$0xff] }
  0x6d   : > { %676 = vmatpush.msra.mxu0 %v659_v2  ;;  %v788_v2 = vld [vmem:[%s2441_s4 + $0x60] sm:$0xff] }
  0x6e   : > { %810 = vmatpush.msrb.mxu2 %v789_v1  ;;  %v801_v1 = vld [vmem:[%s2441_s4 + $0xc8] sm:$0xff] }
  0x6f   : > { %677 = vmatpush.msra.mxu0 %v658_v3  ;;  %v787_v3 = vld [vmem:[%s2441_s4 + $0x58] sm:$0xff] }
  0x70   : > { %811 = vmatpush.msrb.mxu2 %v788_v2 }
  0x71   : > { %678 = vmatpush.msra.mxu0 %v657_v4  ;;  %v786_v4 = vld [vmem:[%s2441_s4 + $0x50] sm:$0xff] }
  0x72   : > { %812 = vmatpush.msrb.mxu2 %v787_v3 }
  0x73   : > { %679 = vmatpush.msra.mxu0 %v656_v5  ;;  %v785_v5 = vld [vmem:[%s2441_s4 + $0x48] sm:$0xff] }
  0x74   : > { %813 = vmatpush.msrb.mxu2 %v786_v4  ;;  %v800_v4 = vld [vmem:[%s2441_s4 + $0xc0] sm:$0xff] }
  0x75   : > { %680 = vmatpush.msra.mxu0 %v655_v6  ;;  %v784_v6 = vld [vmem:[%s2441_s4 + $0x40] sm:$0xff] }
  0x76   : > { %814 = vmatpush.msrb.mxu2 %v785_v5 }
  0x77   : > { %681 = vmatpush.msra.mxu0 %v654_v8  ;;  %v783_v8 = vld [vmem:[%s2441_s4 + $0x38] sm:$0xff] }
  0x78   : > { %815 = vmatpush.msrb.mxu2 %v784_v6  ;;  %v799_v6 = vld [vmem:[%s2441_s4 + $0xb8] sm:$0xff] }
  0x79   : > { %682 = vmatpush.msra.mxu0 %v653_v10  ;;  %v782_v10 = vld [vmem:[%s2441_s4 + $0x30] sm:$0xff] }
  0x7a   : > { %816 = vmatpush.msrb.mxu2 %v783_v8  ;;  %v798_v8 = vld [vmem:[%s2441_s4 + $0xb0] sm:$0xff] }
  0x7b   : > { %683 = vmatpush.msra.mxu0 %v652_v7  ;;  %v781_v7 = vld [vmem:[%s2441_s4 + $0x28] sm:$0xff] }
  0x7c   : > { %817 = vmatpush.msrb.mxu2 %v782_v10  ;;  %v797_v10 = vld [vmem:[%s2441_s4 + $0xa8] sm:$0xff] }
  0x7e   : > { %818 = vmatpush.msrb.mxu2 %v781_v7 }
  0xb9   : > { %v400_v11 = vpop.f32.mrf.mxu0 }
  0xba   : > { %v429_v12 = vpop.f32.mrf.mxu1 }
  0xbb   : > { %v430_v13 = vadd.f32 %v429_v12, %v400_v11  ;;  %v780_v11 = vld [vmem:[%s2441_s4 + $0x20] sm:$0xff]  ;;  %v779_v12 = vld [vmem:[%s2441_s4 + $0x18] sm:$0xff] }
  0xbc   : > { %819 = vmatpush.msrb.mxu2 %v780_v11 }
  0xbe   : > { %v504_v15 = vpop.f32.mrf.mxu2  ;;  %820 = vmatpush.msrb.mxu2 %v779_v12  ;;  %v796_v12 = vld [vmem:[%s2441_s4 + $0xa0] sm:$0xff] }
  0xbf   : > { %v516_v16 = vadd.f32 %v504_v15, %v430_v13  ;;  %v778_v13 = vld [vmem:[%s2441_s4 + $0x10] sm:$0xff]  ;;  %v777_v15 = vld [vmem:[%s2441_s4 + $0x8] sm:$0xff] }
  0xc0   : > { %821 = vmatpush.msrb.mxu2 %v778_v13 }
  0xc1   : > { %v520_v17 = vmax.f32 %v516_v16, 0.0  ;;  %v403_v18 = vpop.f32.mrf.mxu0 }
  0xc2   : > { %v432_v19 = vpop.f32.mrf.mxu1  ;;  %822 = vmatpush.msrb.mxu2 %v777_v15  ;;  %v795_v15 = vld [vmem:[%s2441_s4 + $0x98] sm:$0xff] }
  0xc3   : > { %v528_v20 = vrot.slane %v520_v17, 7  ;;  %593 = vmatmul.f32.vlgmr.msra.gmra.mxu3 %v520_v17  ;;  %v433_v21 = vadd.f32 %v432_v19, %v403_v18  ;;  %v635_v60 = vrot.slane %v520_v17, 1  ;;  %v776_v18 = vld [vmem:[%s2441_s4] sm:$0xff] }
  0xc4   : > { %823 = vmatpush.msrb.mxu2 %v776_v18 }
  0xc5   : > { %v539_v22 = vsel %vm321_vm0, 0.0, %v528_v20 }
  0xc6   : > { %v507_v23 = vpop.f32.mrf.mxu2  ;;  %v540_v24 = vmul.f32 %v2014_v57, %v539_v22 }
  0xc7   : > { %v517_v25 = vadd.f32 %v507_v23, %v433_v21 }
  0xc8   : > { %622 = vmatmul.f32.vlgmr.msrb.gmra.mxu0 %v540_v24 }
  0xc9   : > { %v521_v26 = vmax.f32 %v517_v25, 0.0  ;;  %v406_v27 = vpop.f32.mrf.mxu0 }
  0xca   : > { %v435_v29 = vpop.f32.mrf.mxu1 }
  0xcb   : > { %596 = vmatmul.f32.gmra.mxu3 %v521_v26  ;;  %v436_v31 = vadd.f32 %v435_v29, %v406_v27  ;;  %v529_v32 = vrot.slane %v521_v26, 7  ;;  %v636_v41 = vrot.slane %v521_v26, 1 }
  0xcd   : > { %v530_v36 = vsel %vm321_vm0, %v528_v20, %v529_v32  ;;  %v637_v62 = vsel %vm441_vm2, %v635_v60, %v636_v41 }
  0xce   : > { %v510_v33 = vpop.f32.mrf.mxu2 }
  0xcf   : > { %v518_v34 = vadd.f32 %v510_v33, %v436_v31 }
  0xd0   : > { %625 = vmatmul.f32.gmra.mxu0 %v530_v36 }
  0xd1   : > { %v522_v37 = vmax.f32 %v518_v34, 0.0  ;;  %v409_v38 = vpop.f32.mrf.mxu0 }
  0xd2   : > { %v438_v39 = vpop.f32.mrf.mxu1 }
  0xd3   : > { %v531_v42 = vrot.slane %v522_v37, 7  ;;  %v638_v43 = vrot.slane %v522_v37, 1  ;;  %599 = vmatmul.f32.gmra.mxu3 %v522_v37  ;;  %v439_v44 = vadd.f32 %v438_v39, %v409_v38 }
  0xd5   : > { %v532_v45 = vsel %vm321_vm0, %v529_v32, %v531_v42  ;;  %v639_v46 = vsel %vm441_vm2, %v636_v41, %v638_v43 }
  0xd6   : > { %v513_v47 = vpop.f32.mrf.mxu2  ;;  %v542_v48 = vmul.f32 %v2051_v30, %v532_v45  ;;  %v648_v49 = vmul.f32 %v2031_v9, %v639_v46 }
  0xd7   : > { %v519_v50 = vadd.f32 %v513_v47, %v439_v44 }
  0xd8   : > { %628 = vmatmul.f32.gmra.mxu0 %v542_v48  ;;  %687 = vmatmul.f32.vlgmr.msrb.gmra.mxu1 %v648_v49 }
  0xd9   : > { %v523_v51 = vmax.f32 %v519_v50, 0.0 }
  0xdb   : > { %602 = vmatmul.f32.gmra.mxu3 %v523_v51  ;;  %v533_v52 = vrot.slane %v523_v51, 7  ;;  %v640_v53 = vrot.slane %v523_v51, 1 }
  0xdd   : > { %v534_v54 = vsel %vm321_vm0, %v531_v42, %v533_v52  ;;  %v641_v55 = vsel %vm441_vm2, %v638_v43, %v640_v53  ;;  %v646_v58 = vsel %vm441_vm2, %v640_v53, 0.0  ;;  %v807_v53 = vld [vmem:[%s2441_s4 + $0xf8] sm:$0xff] }
  0xde   : > { %v650_v61 = vmul.f32 %v2061_v40, %v646_v58  ;;  %837 = vmatpush.msrb.mxu3 %v807_v53  ;;  %v1575_v53 = vld [vmem:[%s2440_s3 + $0x40] sm:$0xff] }
  0xe0   : > { %631 = vmatmul.f32.gmra.mxu0 %v534_v54  ;;  %690 = vmatmul.f32.gmra.mxu1 %v641_v55  ;;  %v806_v54 = vld [vmem:[%s2441_s4 + $0xf0] sm:$0xff]  ;;  %v805_v55 = vld [vmem:[%s2441_s4 + $0xe8] sm:$0xff] }
  0xe1   : > { %838 = vmatpush.msrb.mxu3 %v806_v54 }
  0xe3   : > { %839 = vmatpush.msrb.mxu3 %v805_v55 }
  0xe8   : > { %684 = vmatmul.f32.vlgmr.msra.gmra.mxu0 %v637_v62  ;;  %693 = vmatmul.f32.gmra.mxu1 %v650_v61  ;;  %v804_v61 = vld [vmem:[%s2441_s4 + $0xe0] sm:$0xff] }
  0xe9   : > { %840 = vmatpush.msrb.mxu3 %v804_v61  ;;  %v1561_v61 = vsel %vm916_vm10, 1.0, %v1877_v56 }
  0xeb   : > { %841 = vmatpush.msrb.mxu3 %v803_v63  ;;  %v1559_v63 = vsel %vm883_vm9, 1.0, %v1877_v56 }
  0xed   : > { %842 = vmatpush.msrb.mxu3 %v802_v0 }
  0xef   : > { %843 = vmatpush.msrb.mxu3 %v801_v1 }
  0xf1   : > { %844 = vmatpush.msrb.mxu3 %v800_v4 }
  0xf3   : > { %845 = vmatpush.msrb.mxu3 %v799_v6  ;;  %v1586_v6 = vld [vmem:[%s2440_s3 + $0x78] sm:$0xff] }
  0xf5   : > { %846 = vmatpush.msrb.mxu3 %v798_v8  ;;  %v1604_v8 = vld [vmem:[%s2440_s3 + $0xb8] sm:$0xff] }
  0xf7   : > { %847 = vmatpush.msrb.mxu3 %v797_v10  ;;  %v1585_v10 = vld [vmem:[%s2440_s3 + $0x70] sm:$0xff] }
  0xf9   : > { %848 = vmatpush.msrb.mxu3 %v796_v12 }
  0xfb   : > { %849 = vmatpush.msrb.mxu3 %v795_v15 }
 0x145   : > { %v623_v16 = vpop.f32.mrf.mxu0 }
 0x146   : > { %v594_v17 = vpop.f32.mrf.mxu3 }
 0x147   : > { %v624_v31 = vadd.f32 %v623_v16, %v594_v17  ;;  %v794_v16 = vld [vmem:[%s2441_s4 + $0x90] sm:$0xff] }
 0x148   : > { %850 = vmatpush.msrb.mxu3 %v794_v16  ;;  %v1603_v16 = vld [vmem:[%s2440_s3 + $0xb0] sm:$0xff] }
 0x14d   : > { %v626_v19 = vpop.f32.mrf.mxu0 }
 0x14e   : > { %v597_v20 = vpop.f32.mrf.mxu3 }
 0x14f   : > { %v627_v38 = vadd.f32 %v626_v19, %v597_v20  ;;  %v793_v20 = vld [vmem:[%s2441_s4 + $0x88] sm:$0xff] }
 0x150   : > { %851 = vmatpush.msrb.mxu3 %v793_v20  ;;  %v1612_v20 = vld [vmem:[%s2440_s3 + $0xc8] sm:$0xff] }
 0x155   : > { %v629_v21 = vpop.f32.mrf.mxu0  ;;  %v688_v22 = vpop.f32.mrf.mxu1 }
 0x156   : > { %v600_v23 = vpop.f32.mrf.mxu3  ;;  %v2137_v39 = vadd.f32 %v688_v22, %v627_v38 }
 0x157   : > { %v630_v24 = vadd.f32 %v629_v21, %v600_v23  ;;  %v792_v21 = vld [vmem:[%s2441_s4 + $0x80] sm:$0xff] }
 0x158   : > { %852 = vmatpush.msrb.mxu3 %v792_v21  ;;  %v1601_v21 = vld [vmem:[%s2440_s3 + $0xa0] sm:$0xff] }
 0x15d   : > { %v632_v25 = vpop.f32.mrf.mxu0  ;;  %v691_v26 = vpop.f32.mrf.mxu1 }
 0x15e   : > { %v2127_v27 = vadd.f32 %v691_v26, %v630_v24  ;;  %v603_v29 = vpop.f32.mrf.mxu3 }
 0x15f   : > { %v633_v32 = vadd.f32 %v632_v25, %v603_v29 }
 0x160   : > { %709 = vrot.lane.b32.xlu1 %v2127_v27, %s1878_s9 }
 0x165   : > { %v685_v33 = vpop.f32.mrf.mxu0  ;;  %v694_v34 = vpop.f32.mrf.mxu1 }
 0x166   : > { %v2130_v36 = vadd.f32 %v685_v33, %v624_v31  ;;  %v2132_v37 = vadd.f32 %v694_v34, %v633_v32 }
 0x168   : > { %705 = vrot.lane.b32.xlu0 %v2130_v36, %s1878_s9  ;;  %824 = vmatmul.f32.vlgmr.msrb.gmra.mxu2 %v2130_v36 }
 0x169   : > { %711 = vrot.lane.b32.xlu1 %v2132_v37, %s1878_s9 }
 0x170   : > { %707 = vrot.lane.b32.xlu0 %v2137_v39, %s1878_s9  ;;  %827 = vmatmul.f32.gmra.mxu2 %v2137_v39  ;;  %s1821_s9 = scalar_lea.hbm %s2442_s5, 64 }
 0x171   : > { %p1823_p4 = scmp.lt.s32.totalorder %s1821_s9, %s1817_s26 }
 0x173   : > { %p1824_p7 = por %p1823_p4, %p1822_p3 }
 0x175   : > { %p1825_p8 = pnand %p1824_p7, %p1820_p2 }
 0x178   : > { %830 = vmatmul.f32.gmra.mxu2 %v2127_v27 }
 0x180   : > { %833 = vmatmul.f32.gmra.mxu2 %v2132_v37 }
 0x1d2   : > { %v710_v41 = vpop.permute.xlu1 %709 }
 0x1d3   : > { %v720_v42 = vsel %vm717_vm6, %v710_v41, -inf }
 0x1d4   : > { %v724_v43 = vmax.f32 %v2127_v27, %v720_v42  ;;  %v1566_v42 = vld [vmem:[%s2440_s3 + $0x38] sm:$0xff] }
 0x1d5   : > { %962 = vmatpush.msrb.mxu0 %v1566_v42  ;;  %1645 = vmatpush.msra.mxu3 %v1566_v42 }
 0x1d6   : > { %734 = vrot.lane.b32.xlu0 %v724_v43, %s1879_s10 }
 0x1da   : > { %v706_v44 = vpop.permute.xlu0 %705 }
 0x1db   : > { %v718_v45 = vsel %vm717_vm6, %v706_v44, -inf  ;;  %v712_v46 = vpop.permute.xlu1 %711  ;;  %v1565_v44 = vld [vmem:[%s2440_s3 + $0x30] sm:$0xff] }
 0x1dc   : > { %v721_v47 = vsel %vm717_vm6, %v712_v46, -inf  ;;  %v722_v48 = vmax.f32 %v2130_v36, %v718_v45  ;;  %v901_v45 = vld [vmem:[%s2440_s3 + $0x10] sm:$0xff]  ;;  %v1564_v46 = vld [vmem:[%s2440_s3 + $0x28] sm:$0xff]  ;;  %963 = vmatpush.msrb.mxu0 %v1565_v44  ;;  %1646 = vmatpush.msra.mxu3 %v1565_v44 }
 0x1dd   : > { %v725_v49 = vmax.f32 %v2132_v37, %v721_v47  ;;  %v900_v47 = vld [vmem:[%s2440_s3 + $0x8] sm:$0xff] }
 0x1de   : > { %730 = vrot.lane.b32.xlu2 %v722_v48, %s1879_s10  ;;  %964 = vmatpush.msrb.mxu0 %v1564_v46 }
 0x1df   : > { %736 = vrot.lane.b32.xlu1 %v725_v49, %s1879_s10  ;;  %1647 = vmatpush.msra.mxu3 %v1564_v46  ;;  %v1562_v46 = vsel %vm918_vm14, 1.0, %v1877_v56 }
 0x1e2   : > { %v708_v50 = vpop.permute.xlu0 %707 }
 0x1e3   : > { %v719_v51 = vsel %vm717_vm6, %v708_v50, -inf  ;;  %v1578_v50 = vld [vmem:[%s2440_s3 + $0x58] sm:$0xff] }
 0x1e4   : > { %v723_v52 = vmax.f32 %v2137_v39, %v719_v51  ;;  %v1577_v51 = vld [vmem:[%s2440_s3 + $0x50] sm:$0xff]  ;;  %1649 = vmatpush.msra.mxu2 %v1578_v50 }
 0x1e6   : > { %732 = vrot.lane.b32.xlu2 %v723_v52, %s1879_s10  ;;  %1650 = vmatpush.msra.mxu2 %v1577_v51 }
 0x1eb   : > { %v825_v54 = vpop.f32.mrf.mxu2 }
 0x238   : > { %v731_v58 = vpop.permute.xlu2 %730 }
 0x239   : > { %v743_v60 = vsel %vm742_vm7, %v731_v58, -inf }
 0x23a   : > { %v747_v62 = vmax.f32 %v722_v48, %v743_v60  ;;  %v1563_v48 = vld [vmem:[%s2440_s3 + $0x20] sm:$0xff] }
 0x23b   : > { %965 = vmatpush.msrb.mxu0 %v1563_v48  ;;  %1648 = vmatpush.msra.mxu3 %v1563_v48 }
 0x23c   : > { %755 = vrot.lane.b32.xlu2 %v747_v62, %s1880_s30 }
 0x23d   : > { %1065 = vmatpush.msra.mxu0 %v1578_v50 }
 0x23f   : > { %1066 = vmatpush.msra.mxu0 %v1577_v51 }
 0x240   : > { %v733_v2 = vpop.permute.xlu2 %732 }
 0x241   : > { %v744_v3 = vsel %vm742_vm7, %v733_v2, -inf }
 0x242   : > { %v748_v5 = vmax.f32 %v723_v52, %v744_v3  ;;  %v1576_v52 = vld [vmem:[%s2440_s3 + $0x48] sm:$0xff]  ;;  %v1594_v3 = vld [vmem:[%s2440_s3 + $0x98] sm:$0xff] }
 0x243   : > { %1067 = vmatpush.msra.mxu0 %v1576_v52  ;;  %1651 = vmatpush.msra.mxu2 %v1576_v52 }
 0x244   : > { %757 = vrot.lane.b32.xlu0 %v748_v5, %s1880_s30 }
 0x245   : > { %1068 = vmatpush.msra.mxu0 %v1575_v53  ;;  %1652 = vmatpush.msra.mxu2 %v1575_v53 }
 0x248   : > { %v735_v7 = vpop.permute.xlu0 %734 }
 0x249   : > { %v745_v11 = vsel %vm742_vm7, %v735_v7, -inf  ;;  %v1592_v7 = vld [vmem:[%s2440_s3 + $0x88] sm:$0xff] }
 0x24a   : > { %v749_v13 = vmax.f32 %v724_v43, %v745_v11  ;;  %v902_v43 = vld [vmem:[%s2440_s3 + $0x18] sm:$0xff] }
 0x24b   : > { %1003 = vmatpush.msra.mxu1 %v902_v43  ;;  %v1614_v11 = vld [vmem:[%s2440_s3 + $0xd8] sm:$0xff] }
 0x24c   : > { %759 = vrot.lane.b32.xlu1 %v749_v13, %s1880_s30  ;;  %1335 = vmatpush.msrb.mxu2 %v1614_v11 }
 0x24d   : > { %1004 = vmatpush.msra.mxu1 %v901_v45 }
 0x24f   : > { %1005 = vmatpush.msra.mxu1 %v900_v47  ;;  %v1560_v47 = vsel %vm885_vm15, 1.0, %v1877_v56 }
 0x251   : > { %v737_v17 = vpop.permute.xlu1 %736 }
 0x252   : > { %v746_v18 = vsel %vm742_vm7, %v737_v17, -inf  ;;  %v1584_v17 = vld [vmem:[%s2440_s3 + $0x68] sm:$0xff] }
 0x253   : > { %v750_v19 = vmax.f32 %v725_v49, %v746_v18  ;;  %v899_v49 = vld [vmem:[%s2440_s3] sm:$0xff]  ;;  %v1613_v18 = vld [vmem:[%s2440_s3 + $0xd0] sm:$0xff] }
 0x254   : > { %1006 = vmatpush.msra.mxu1 %v899_v49  ;;  %1336 = vmatpush.msrb.mxu2 %v1613_v18 }
 0x255   : > { %761 = vrot.lane.b32.xlu2 %v750_v19, %s1880_s30 }
 0x256   : > { %1256 = vmatpush.msrb.mxu1 %v1604_v8  ;;  %1337 = vmatpush.msrb.mxu2 %v1612_v20 }
 0x258   : > { %1257 = vmatpush.msrb.mxu1 %v1603_v16 }
 0x296   : > { %v756_v22 = vpop.permute.xlu2 %755 }
 0x297   : > { %v768_v23 = vsel %vm767_vm8, %v756_v22, -inf  ;;  %v1611_v22 = vld [vmem:[%s2440_s3 + $0xc0] sm:$0xff] }
 0x298   : > { %v772_v24 = vmax.f32 %v747_v62, %v768_v23  ;;  %v828_v23 = vpop.f32.mrf.mxu2  ;;  %1338 = vmatpush.msrb.mxu2 %v1611_v22 }
 0x29a   : > { %853 = vmatmul.f32.vlgmr.msrb.gmra.mxu3 %v772_v24 }
 0x29b   : > { %1111 = vmatpush.msrb.mxu3 %v1586_v6 }
 0x29d   : > { %1112 = vmatpush.msrb.mxu3 %v1585_v10 }
 0x29f   : > { %1113 = vmatpush.msrb.mxu3 %v1584_v17 }
 0x2a0   : > { %v831_v43 = vpop.f32.mrf.mxu2 }
 0x2af   : > { %v762_v34 = vpop.permute.xlu2 %761 }
 0x2b0   : > { %v771_v38 = vsel %vm767_vm8, %v762_v34, -inf }
 0x2b1   : > { %v775_v41 = vmax.f32 %v750_v19, %v771_v38  ;;  %v1602_v19 = vld [vmem:[%s2440_s3 + $0xa8] sm:$0xff] }
 0x2b2   : > { %1258 = vmatpush.msrb.mxu1 %v1602_v19 }
 0x2b4   : > { %1259 = vmatpush.msrb.mxu1 %v1601_v21 }
 0x2b6   : > { %v758_v25 = vpop.permute.xlu0 %757 }
 0x2b7   : > { %v769_v26 = vsel %vm767_vm8, %v758_v25, -inf }
 0x2b8   : > { %v773_v29 = vmax.f32 %v748_v5, %v769_v26  ;;  %v1593_v5 = vld [vmem:[%s2440_s3 + $0x90] sm:$0xff] }
 0x2ba   : > { %856 = vmatmul.f32.gmra.mxu3 %v773_v29 }
 0x2be   : > { %v760_v31 = vpop.permute.xlu1 %759 }
 0x2bf   : > { %v770_v32 = vsel %vm767_vm8, %v760_v31, -inf }
 0x2c0   : > { %v774_v33 = vmax.f32 %v749_v13, %v770_v32  ;;  %v1591_v13 = vld [vmem:[%s2440_s3 + $0x80] sm:$0xff] }
 0x2c2   : > { %859 = vmatmul.f32.gmra.mxu3 %v774_v33 }
 0x2ca   : > { %862 = vmatmul.f32.gmra.mxu3 %v775_v41 }
 0x31d   : > { %v854_v55 = vpop.f32.mrf.mxu3 }
 0x31e   : > { %v2241_v58 = vadd.f32 %v854_v55, %v825_v54 }
 0x320   : > { %v904_v60 = vrot.slane %v2241_v58, 6  ;;  %v871_v62 = vrot.slane %v2241_v58, 5  ;;  %v1020_v4 = vrot.slane %v2241_v58, 7  ;;  %v1132_v26 = vrot.slane %v2241_v58, 1 }
 0x321   : > { %v1199_v11 = vrot.slane %v2241_v58, 2 }
 0x322   : > { %v915_v0 = vsel %vm903_vm11, 0.0, %v904_v60  ;;  %v882_v1 = vsel %vm870_vm12, 0.0, %v871_v62  ;;  %v1031_v12 = vsel %vm321_vm0, 0.0, %v1020_v4 }
 0x323   : > { %v928_v35 = vmul.f32 %v1561_v61, %v915_v0  ;;  %v895_v2 = vmul.f32 %v1559_v63, %v882_v1  ;;  %v1032_v15 = vmul.f32 %v2014_v57, %v1031_v12  ;;  %v1583_v57 = vld [vmem:[%s2440_s3 + $0x60] sm:$0xff]  ;;  %v834_v63 = vpop.f32.mrf.mxu2  ;;  %v1278_v12 = vrot.slane %v2241_v58, 3 }
 0x324   : > { %1114 = vmatpush.msrb.mxu3 %v1583_v57 }
 0x325   : > { %1567 = vmatmul.msk.f32.vlgmr.msrb.gmra.mxu0 %vm937_vm13, %v928_v35  ;;  %1571 = vmatmul.msk.f32.vlgmr.msra.gmra.mxu1 %vm937_vm13, %v895_v2 }
 0x326   : > { %1177 = vmatpush.msrb.mxu0 %v1594_v3 }
 0x328   : > { %1178 = vmatpush.msrb.mxu0 %v1593_v5 }
 0x32a   : > { %1179 = vmatpush.msrb.mxu0 %v1592_v7 }
 0x32c   : > { %1180 = vmatpush.msrb.mxu0 %v1591_v13 }
 0x32d   : > { %1579 = vmatmul.msk.f32.vlgmr.msra.gmra.mxu0 %vm937_vm13, %v1032_v15 }
 0x33d   : > { %v857_v24 = vpop.f32.mrf.mxu3 }
 0x33e   : > { %v2303_v25 = vadd.f32 %v857_v24, %v828_v23 }
 0x340   : > { %v905_v29 = vrot.slane %v2303_v25, 6  ;;  %v872_v31 = vrot.slane %v2303_v25, 5  ;;  %v1021_v32 = vrot.slane %v2303_v25, 7  ;;  %v1133_v33 = vrot.slane %v2303_v25, 1 }
 0x341   : > { %v1200_v8 = vrot.slane %v2303_v25, 2  ;;  %v1279_v7 = vrot.slane %v2303_v25, 3 }
 0x342   : > { %v906_v34 = vsel %vm903_vm11, %v904_v60, %v905_v29  ;;  %v873_v38 = vsel %vm870_vm12, %v871_v62, %v872_v31  ;;  %v1022_v41 = vsel %vm321_vm0, %v1020_v4, %v1021_v32  ;;  %v1134_v42 = vsel %vm441_vm2, %v1132_v26, %v1133_v33 }
 0x343   : > { %1568 = vmatmul.msk.f32.vlgmr.msra.gmra.mxu3 %vm937_vm13, %v906_v34  ;;  %1572 = vmatmul.msk.f32.gmra.mxu1 %vm937_vm13, %v873_v38  ;;  %v1201_v15 = vsel %vm1198_vm1, %v1199_v11, %v1200_v8  ;;  %v1280_v17 = vsel %vm1277_vm3, %v1278_v12, %v1279_v7  ;;  %v1600_v26 = vsel %vm1214_vm4, 1.0, %v1877_v56 }
 0x344   : > { %1580 = vmatmul.msk.f32.vlgmr.msra.gmra.mxu2 %vm937_vm13, %v1022_v41  ;;  %1595 = vmatmul.msk.f32.vlgmr.msrb.gmra.mxu0 %vm937_vm13, %v1134_v42 }
 0x345   : > { %v860_v44 = vpop.f32.mrf.mxu3 }
 0x346   : > { %v2320_v45 = vadd.f32 %v860_v44, %v831_v43 }
 0x348   : > { %v907_v48 = vrot.slane %v2320_v45, 6  ;;  %v874_v49 = vrot.slane %v2320_v45, 5  ;;  %v1023_v50 = vrot.slane %v2320_v45, 7  ;;  %v1135_v51 = vrot.slane %v2320_v45, 1 }
 0x349   : > { %v1202_v16 = vrot.slane %v2320_v45, 2  ;;  %v1281_v18 = vrot.slane %v2320_v45, 3 }
 0x34a   : > { %v908_v52 = vsel %vm903_vm11, %v905_v29, %v907_v48  ;;  %v875_v53 = vsel %vm870_vm12, %v872_v31, %v874_v49  ;;  %v1024_v14 = vsel %vm321_vm0, %v1021_v32, %v1023_v50  ;;  %v1136_v54 = vsel %vm441_vm2, %v1133_v33, %v1135_v51 }
 0x34b   : > { %v930_v55 = vmul.f32 %v1562_v46, %v908_v52  ;;  %v897_v60 = vmul.f32 %v1560_v47, %v875_v53  ;;  %v1034_v61 = vmul.f32 %v2051_v30, %v1024_v14  ;;  %v1145_v62 = vmul.f32 %v2031_v9, %v1136_v54 }
 0x34c   : > { %v1610_v31 = vsel %vm1293_vm5, 1.0, %v1877_v56 }
 0x34d   : > { %v863_v0 = vpop.f32.mrf.mxu3  ;;  %1569 = vmatmul.msk.f32.gmra.mxu3 %vm937_vm13, %v930_v55  ;;  %1573 = vmatmul.msk.f32.gmra.mxu1 %vm937_vm13, %v897_v60 }
 0x34e   : > { %v864_v1 = vadd.f32 %v863_v0, %v834_v63  ;;  %1581 = vmatmul.msk.f32.gmra.mxu2 %vm937_vm13, %v1034_v61  ;;  %1596 = vmatmul.msk.f32.gmra.mxu0 %vm937_vm13, %v1145_v62 }
 0x350   : > { %v909_v35 = vrot.slane %v864_v1, 6  ;;  %v876_v2 = vrot.slane %v864_v1, 5  ;;  %v1025_v3 = vrot.slane %v864_v1, 7  ;;  %v1137_v4 = vrot.slane %v864_v1, 1 }
 0x351   : > { %v1204_v22 = vrot.slane %v864_v1, 2  ;;  %v1283_v23 = vrot.slane %v864_v1, 3 }
 0x352   : > { %v910_v5 = vsel %vm903_vm11, %v907_v48, %v909_v35  ;;  %v877_v30 = vsel %vm870_vm12, %v874_v49, %v876_v2  ;;  %v1026_v9 = vsel %vm321_vm0, %v1023_v50, %v1025_v3  ;;  %v1138_v6 = vsel %vm441_vm2, %v1135_v51, %v1137_v4 }
 0x353   : > { %v1143_v10 = vsel %vm441_vm2, %v1137_v4, 0.0  ;;  %vm1212_vm0 = vcmp.lt.s32.totalorder %v2019_v59, 14  ;;  %vm1291_vm2 = vcmp.lt.s32.totalorder %v2019_v59, 13  ;;  %v1205_v59 = vsel %vm1198_vm1, %v1202_v16, %v1204_v22 }
 0x354   : > { %v1147_v13 = vmul.f32 %v2061_v40, %v1143_v10  ;;  %v1203_v40 = vsel %vm1198_vm1, %v1200_v8, %v1202_v16  ;;  %v1599_v57 = vsel %vm1212_vm0, 1.0, %v1877_v56  ;;  %v1609_v19 = vsel %vm1291_vm2, 1.0, %v1877_v56 }
 0x355   : > { %1570 = vmatmul.msk.f32.gmra.mxu3 %vm937_vm13, %v910_v5  ;;  %1574 = vmatmul.msk.f32.gmra.mxu1 %vm937_vm13, %v877_v30  ;;  %v1224_v20 = vmul.f32 %v1599_v57, %v1203_v40  ;;  %v1284_v24 = vsel %vm1277_vm3, %v1281_v18, %v1283_v23  ;;  %v1289_v29 = vsel %vm1277_vm3, %v1283_v23, 0.0 }
 0x356   : > { %1582 = vmatmul.msk.f32.gmra.mxu2 %vm937_vm13, %v1026_v9  ;;  %1597 = vmatmul.msk.f32.gmra.mxu0 %vm937_vm13, %v1138_v6  ;;  %v1305_v33 = vmul.f32 %v1610_v31, %v1289_v29 }
 0x35d   : > { %1587 = vmatmul.msk.f32.vlgmr.msrb.gmra.mxu3 %vm937_vm13, %v2241_v58  ;;  %1605 = vmatmul.msk.f32.vlgmr.msrb.gmra.mxu1 %vm937_vm13, %v1201_v15  ;;  %v1282_v58 = vsel %vm1277_vm3, %v1279_v7, %v1281_v18 }
 0x35e   : > { %1598 = vmatmul.msk.f32.gmra.mxu0 %vm937_vm13, %v1147_v13  ;;  %1615 = vmatmul.msk.f32.vlgmr.msrb.gmra.mxu2 %vm937_vm13, %v1280_v17  ;;  %v1303_v21 = vmul.f32 %v1609_v19, %v1282_v58 }
 0x365   : > { %1588 = vmatmul.msk.f32.gmra.mxu3 %vm937_vm13, %v2303_v25  ;;  %1606 = vmatmul.msk.f32.gmra.mxu1 %vm937_vm13, %v1224_v20  ;;  %v1210_v25 = vsel %vm1198_vm1, %v1204_v22, 0.0 }
 0x366   : > { %1616 = vmatmul.msk.f32.gmra.mxu2 %vm937_vm13, %v1303_v21  ;;  %v1226_v32 = vmul.f32 %v1600_v26, %v1210_v25 }
 0x36d   : > { %1589 = vmatmul.msk.f32.gmra.mxu3 %vm937_vm13, %v2320_v45  ;;  %1607 = vmatmul.msk.f32.gmra.mxu1 %vm937_vm13, %v1205_v59 }
 0x36e   : > { %1617 = vmatmul.msk.f32.gmra.mxu2 %vm937_vm13, %v1284_v24 }
 0x375   : > { %1590 = vmatmul.msk.f32.gmra.mxu3 %vm937_vm13, %v864_v1  ;;  %1608 = vmatmul.msk.f32.gmra.mxu1 %vm937_vm13, %v1226_v32 }
 0x376   : > { %1618 = vmatmul.msk.f32.gmra.mxu2 %vm937_vm13, %v1305_v33 }
 0x3a2   : > { %v1008_v34 = vpop.f32.mrf.mxu1  ;;  %v967_v43 = vpop.f32.mrf.mxu0 }
 0x3a3   : > { %v1009_v49 = vadd.f32 %v1008_v34, %v967_v43 }
 0x3aa   : > { %v1070_v47 = vpop.f32.mrf.mxu0 }
 0x3ab   : > { %v1082_v52 = vadd.f32 %v1070_v47, %v1009_v49 }
 0x3c0   : > { %v1011_v38 = vpop.f32.mrf.mxu1 }
 0x3c1   : > { %v1182_v50 = vpop.f32.mrf.mxu0 }
 0x3c6   : > { %v970_v41 = vpop.f32.mrf.mxu3 }
 0x3c7   : > { %v1073_v28 = vpop.f32.mrf.mxu2  ;;  %v1012_v55 = vadd.f32 %v1011_v38, %v970_v41 }
 0x3c9   : > { %v1083_v63 = vadd.f32 %v1073_v28, %v1012_v55 }
 0x3ca   : > { %v1014_v42 = vpop.f32.mrf.mxu1 }
 0x3cb   : > { %v1185_v62 = vpop.f32.mrf.mxu0 }
 0x3d0   : > { %v973_v44 = vpop.f32.mrf.mxu3 }
 0x3d1   : > { %v1076_v45 = vpop.f32.mrf.mxu2  ;;  %v1015_v5 = vadd.f32 %v1014_v42, %v973_v44 }
 0x3d2   : > { %v1017_v46 = vpop.f32.mrf.mxu1 }
 0x3d3   : > { %v1084_v6 = vadd.f32 %v1076_v45, %v1015_v5  ;;  %v1188_v10 = vpop.f32.mrf.mxu0 }
 0x3d8   : > { %v976_v48 = vpop.f32.mrf.mxu3 }
 0x3d9   : > { %v1079_v56 = vpop.f32.mrf.mxu2  ;;  %v1018_v17 = vadd.f32 %v1017_v46, %v976_v48 }
 0x3da   : > { %v1261_v51 = vpop.f32.mrf.mxu1 }
 0x3db   : > { %v1085_v58 = vadd.f32 %v1079_v56, %v1018_v17  ;;  %v1191_v24 = vpop.f32.mrf.mxu0 }
 0x3e0   : > { %v1116_v53 = vpop.f32.mrf.mxu3 }
 0x3e1   : > { %v1128_v14 = vadd.f32 %v1116_v53, %v1082_v52  ;;  %v1340_v54 = vpop.f32.mrf.mxu2 }
 0x3e2   : > { %v1264_v1 = vpop.f32.mrf.mxu1 }
 0x3e3   : > { %v1194_v60 = vadd.f32 %v1182_v50, %v1128_v14  ;;  %v1737_v14 = vld [vmem:[%s1992_s6] sm:$0xff] }
 0x3e5   : > { %v1273_v61 = vadd.f32 %v1261_v51, %v1194_v60 }
 0x3e7   : > { %v1352_v0 = vadd.f32 %v1340_v54, %v1273_v61 }
 0x3e8   : > { %v1119_v35 = vpop.f32.mrf.mxu3 }
 0x3e9   : > { %v1619_v2 = vmul.f32 -1.442695, %v1352_v0  ;;  %v1129_v3 = vadd.f32 %v1119_v35, %v1083_v63  ;;  %v1343_v4 = vpop.f32.mrf.mxu2 }
 0x3ea   : > { %v1267_v16 = vpop.f32.mrf.mxu1 }
 0x3eb   : > { %1721 = vpow2.f32 %v1619_v2  ;;  %v1195_v30 = vadd.f32 %v1185_v62, %v1129_v3 }
 0x3ed   : > { %v1274_v9 = vadd.f32 %v1264_v1, %v1195_v30  ;;  %v1738_v30 = vld [vmem:[%s1992_s6 + $0x8] sm:$0xff] }
 0x3ef   : > { %v1353_v8 = vadd.f32 %v1343_v4, %v1274_v9 }
 0x3f0   : > { %v1122_v7 = vpop.f32.mrf.mxu3 }
 0x3f1   : > { %v1722_v11 = vpop.eup %1721  ;;  %v1620_v12 = vmul.f32 -1.442695, %v1353_v8  ;;  %v1130_v13 = vadd.f32 %v1122_v7, %v1084_v6  ;;  %v1346_v40 = vpop.f32.mrf.mxu2 }
 0x3f2   : > { %v1368_v15 = vadd.f32 1.0, %v1722_v11  ;;  %v1270_v31 = vpop.f32.mrf.mxu1 }
 0x3f3   : > { %1723 = vpow2.f32 %v1620_v12  ;;  %v1196_v18 = vadd.f32 %v1188_v10, %v1130_v13 }
 0x3f4   : > { %1725 = vrcp.f32 %v1368_v15  ;;  %v1383_v34 = vand.u32 2147483648, %v1368_v15  ;;  %v1381_v28 = vand.u32 2147483647, %v1368_v15  ;;  %vm1377_vm7 = vweird.f32 %v1368_v15 }
 0x3f5   : > { %v1275_v57 = vadd.f32 %v1267_v16, %v1196_v18  ;;  %v1739_v18 = vld [vmem:[%s1992_s6 + $0x10] sm:$0xff] }
 0x3f6   : > { %v1384_v47 = vor.u32 1.1754944e-38, %v1383_v34  ;;  %vm1382_vm9 = vcmp.eq.f32.partialorder %v1381_v28, 8.507059e+37 }
 0x3f7   : > { %v1354_v19 = vadd.f32 %v1346_v40, %v1275_v57 }
 0x3f8   : > { %v1125_v20 = vpop.f32.mrf.mxu3 }
 0x3f9   : > { %v1724_v21 = vpop.eup %1723  ;;  %v1621_v22 = vmul.f32 -1.442695, %v1354_v19  ;;  %v1131_v23 = vadd.f32 %v1125_v20, %v1085_v58  ;;  %v1349_v38 = vpop.f32.mrf.mxu2 }
 0x3fa   : > { %v1726_v59 = vpop.eup %1725  ;;  %v1369_v25 = vadd.f32 1.0, %v1724_v21 }
 0x3fb   : > { %v1373_v26 = vmul.f32 %v1726_v59, %v1368_v15  ;;  %1727 = vpow2.f32 %v1621_v22  ;;  %v1197_v29 = vadd.f32 %v1191_v24, %v1131_v23  ;;  %vm1378_vm6 = vweird.f32 %v1726_v59  ;;  %v1740_v23 = vld [vmem:[%s1992_s6 + $0x18] sm:$0xff] }
 0x3fc   : > { %1729 = vrcp.f32 %v1369_v25  ;;  %vm1379_vm8 = vmor %vm1377_vm7, %vm1378_vm6  ;;  %v1398_v53 = vand.u32 2147483648, %v1369_v25  ;;  %v1396_v60 = vand.u32 2147483647, %v1369_v25  ;;  %vm1392_vm11 = vweird.f32 %v1369_v25 }
 0x3fd   : > { %v1374_v32 = vsub.f32 1.0, %v1373_v26  ;;  %v1276_v33 = vadd.f32 %v1270_v31, %v1197_v29 }
 0x3fe   : > { %v1399_v0 = vor.u32 1.1754944e-38, %v1398_v53  ;;  %vm1397_vm13 = vcmp.eq.f32.partialorder %v1396_v60, 8.507059e+37 }
 0x3ff   : > { %v1375_v41 = vmul.f32 %v1726_v59, %v1374_v32  ;;  %v1355_v42 = vadd.f32 %v1349_v38, %v1276_v33 }
 0x401   : > { %v1728_v43 = vpop.eup %1727  ;;  %v1376_v44 = vadd.f32 %v1726_v59, %v1375_v41  ;;  %v1622_v45 = vmul.f32 -1.442695, %v1355_v42 }
 0x402   : > { %v1730_v46 = vpop.eup %1729  ;;  %v1370_v48 = vadd.f32 1.0, %v1728_v43 }
 0x403   : > { %v1380_v56 = vsel %vm1379_vm8, %v1726_v59, %v1376_v44  ;;  %v1388_v49 = vmul.f32 %v1730_v46, %v1369_v25  ;;  %1731 = vpow2.f32 %v1622_v45  ;;  %vm1393_vm10 = vweird.f32 %v1730_v46 }
 0x404   : > { %v1385_v50 = vsel %vm1382_vm9, %v1384_v47, %v1380_v56  ;;  %1733 = vrcp.f32 %v1370_v48  ;;  %vm1394_vm12 = vmor %vm1392_vm11, %vm1393_vm10  ;;  %v1413_v5 = vand.u32 2147483648, %v1370_v48  ;;  %v1411_v8 = vand.u32 2147483647, %v1370_v48 }
 0x405   : > { %v1432_v51 = vmul.f32 %v1385_v50, %v2130_v36  ;;  %v1389_v52 = vsub.f32 1.0, %v1388_v49  ;;  %vm1407_vm15 = vweird.f32 %v1370_v48 }
 0x406   : > { %v1414_v11 = vor.u32 1.1754944e-38, %v1413_v5  ;;  %vm1412_vm3 = vcmp.eq.f32.partialorder %v1411_v8, 8.507059e+37 }
 0x407   : > { %v1436_v54 = vadd.f32 %v1737_v14, %v1432_v51  ;;  %v1390_v55 = vmul.f32 %v1730_v46, %v1389_v52 }
 0x409   : > { %v1732_v61 = vpop.eup %1731  ;;  %v1391_v62 = vadd.f32 %v1730_v46, %v1390_v55  ;;  %1440 = vst [vmem:[%s2391_s13] sm:$0xff] %v1436_v54 }
 0x40a   : > { %v1734_v63 = vpop.eup %1733  ;;  %v1371_v1 = vadd.f32 1.0, %v1732_v61 }
 0x40b   : > { %v1395_v36 = vsel %vm1394_vm12, %v1730_v46, %v1391_v62  ;;  %v1403_v35 = vmul.f32 %v1734_v63, %v1370_v48  ;;  %vm1408_vm14 = vweird.f32 %v1734_v63 }
 0x40c   : > { %v1400_v2 = vsel %vm1397_vm13, %v1399_v0, %v1395_v36  ;;  %1735 = vrcp.f32 %v1371_v1  ;;  %vm1409_vm1 = vmor %vm1407_vm15, %vm1408_vm14  ;;  %v1428_v17 = vand.u32 2147483648, %v1371_v1  ;;  %v1426_v58 = vand.u32 2147483647, %v1371_v1 }
 0x40d   : > { %v1433_v3 = vmul.f32 %v1400_v2, %v2137_v39  ;;  %v1404_v4 = vsub.f32 1.0, %v1403_v35  ;;  %vm1422_vm2 = vweird.f32 %v1371_v1 }
 0x40e   : > { %vm1427_vm5 = vcmp.eq.f32.partialorder %v1426_v58, 8.507059e+37 }
 0x40f   : > { %v1437_v9 = vadd.f32 %v1738_v30, %v1433_v3  ;;  %v1405_v6 = vmul.f32 %v1734_v63, %v1404_v4 }
 0x411   : > { %v1406_v10 = vadd.f32 %v1734_v63, %v1405_v6  ;;  %1441 = vst [vmem:[%s2391_s13 + $0x8] sm:$0xff] %v1437_v9 }
 0x412   : > { %v1736_v7 = vpop.eup %1735 }
 0x413   : > { %v1410_v12 = vsel %vm1409_vm1, %v1734_v63, %v1406_v10  ;;  %v1418_v13 = vmul.f32 %v1736_v7, %v1371_v1  ;;  %vm1423_vm0 = vweird.f32 %v1736_v7 }
 0x414   : > { %v1415_v39 = vsel %vm1412_vm3, %v1414_v11, %v1410_v12  ;;  %vm1424_vm4 = vmor %vm1422_vm2, %vm1423_vm0 }
 0x415   : > { %v1434_v15 = vmul.f32 %v1415_v39, %v2127_v27  ;;  %v1419_v16 = vsub.f32 1.0, %v1418_v13  ;;  %v1429_v27 = vor.u32 1.1754944e-38, %v1428_v17 }
 0x417   : > { %v1438_v40 = vadd.f32 %v1739_v18, %v1434_v15  ;;  %v1420_v57 = vmul.f32 %v1736_v7, %v1419_v16 }
 0x419   : > { %v1421_v19 = vadd.f32 %v1736_v7, %v1420_v57  ;;  %1442 = vst [vmem:[%s2391_s13 + $0x10] sm:$0xff] %v1438_v40 }
 0x41b   : > { %v1425_v20 = vsel %vm1424_vm4, %v1736_v7, %v1421_v19 }
 0x41c   : > { %v1430_v21 = vsel %vm1427_vm5, %v1429_v27, %v1425_v20 }
 0x41d   : > { %v1435_v22 = vmul.f32 %v1430_v21, %v2132_v37 }
 0x41f   : > { %v1439_v59 = vadd.f32 %v1740_v23, %v1435_v22 }
 0x421   : > { %1443 = vst [vmem:[%s2391_s13 + $0x18] sm:$0xff] %v1439_v59 }
 0x422   : > { %1828 = shalt.err (!%p1825_p8)
}
 0x423   : > { %s1881_s6 = smov 128   ;;  %s1882_s11 = smov 8  }
 0x424   : > { %1661 = dma.vmem_to_hbm [thread:$0]  (%p1951_p5), %s1458_s22, 512, %s1460_s17, %s1445_s23, %s1881_s6, %s1881_s6, %s1882_s11  }
 0x425 PF: > { %p1678_p9 = scmp.ge.s32.totalorder %s1871_s21, 2  ;;  %s1474_s13 = sand.u32 1, %s1859_s18  }
 0x426   : > { %s1475_s14 = scalar_lea.sflag [#allocation4], %s1474_s13 }
 0x427   : > { %p1671_p10 = pnand %p1678_p9, %p1955_p6 }
 0x429   : > { %p1672_p11 = pneg %p1671_p10 }
 0x42b   : > { %1854 = dma.done.wait (%p1672_p11), %s1475_s14, 512  }
 0x42c   : > { %1856 = vsyncadd (%p1672_p11), %s1475_s14, 4294966784  ;;  %p17_p12 = scmp.ge.s32.totalorder %s1938_s24, 4   ;;  %s2446_s18 = smov %s1863_s19 }
 0x42d   : > { %s2447_s19 = smov %s1867_s20  ;;  %s2448_s20 = smov %s1949_s27 }
 0x42e   : > { %s2449_s21 = smov %s1938_s24  ;;  %19 = sbr.rel (!%p17_p12) target bundleno = 5 (0x5), region = 94 }
 0x433   :  { %1481 = vsyncpa [#allocation3], 1 }
 0x434   :  { %1483 = vsyncpa [#allocation3 + $0x1], 1 }
 0x435   :  { %1484 = vsyncpa [#allocation6], 1 }
 0x436   :  { %1485 = vsyncpa [#allocation4], 1 }
 0x437   :  { %1487 = vsyncpa [#allocation4 + $0x1], 1 }

</bundles_post_ra>
